<compile_context>
chip_gen: v7x
topology: tpu7x:2x2x1
jax: 0.10.0
libtpu: 0.0.40
codegen_flags: <defaults>
</compile_context>

<pallas_src>
import functools
import math

import jax
import jax.numpy as jnp
from jax.experimental import pallas as pl
from jax.experimental.pallas import tpu as pltpu

KSIZE = 16
EPS = 1e-6
LEFT_PAD = (KSIZE - 1) // 2          # 7  (PyTorch 'same' for even K: 7 left / 8 right)
RIGHT_PAD = (KSIZE - 1) - LEFT_PAD   # 8
HALO = 8                             # sublane-aligned halo rows on each side


def _round_up(n, m):
    return ((n + m - 1) // m) * m


# ---------------------------------------------------------------------------
# Exact (erf-based) GELU.  erf via Abramowitz & Stegun 7.1.26 (|err| <= 1.5e-7).
# The 0.5 factor of Phi(x) is folded into the polynomial coefficients, the
# reciprocal and exp run on the EUP, and the polynomial can optionally run in
# bf16 (v6e/v7x bf16 VALU).
# ---------------------------------------------------------------------------
_GP = 0.3275911
_GH1 = 0.254829592 / 2.0
_GH2 = -0.284496736 / 2.0
_GH3 = 1.421413741 / 2.0
_GH4 = -1.453152027 / 2.0
_GH5 = 1.061405429 / 2.0
_INV_SQRT2 = 0.7071067811865476


def _gelu_exact(x, compute_dtype=jnp.float32):
    f32 = jnp.float32
    is_bf16 = jnp.dtype(compute_dtype) == jnp.dtype(jnp.bfloat16)
    xd = x.astype(compute_dtype)
    az = jnp.abs(xd) * _INV_SQRT2                       # |x| / sqrt(2)
    denom = az * _GP + 1.0
    # EUP reciprocal; approximate only on the (already lossy) bf16 fast path.
    t = pl.reciprocal(denom.astype(f32), approx=is_bf16).astype(compute_dtype)
    poly = ((((_GH5 * t + _GH4) * t + _GH3) * t + _GH2) * t + _GH1) * t
    e = jnp.exp(-(az * az).astype(f32))                 # EUP
    q = poly.astype(f32) * e                            # = 0.5 * erfc(|x|/sqrt2)
    cdf = jnp.where(x >= 0.0, 1.0 - q, q)               # Phi(x)
    return x * cdf


# ---------------------------------------------------------------------------
# One-time capability probe: does pltpu.roll lower on the sublane axis on this
# backend, and with which shift convention?  'jnp'  -> out[i] = x[(i-shift)%n],
# 'inv' -> out[i] = x[(i+shift)%n], None -> unsupported (fall back to slices).
# ---------------------------------------------------------------------------
@functools.lru_cache(maxsize=1)
def _sublane_roll_mode():
    def _k(x_ref, o_ref):
        o_ref[...] = pltpu.roll(x_ref[...], shift=1, axis=0)

    try:
        n = 48
        x = jnp.broadcast_to(jnp.arange(n, dtype=jnp.float32)[:, None], (n, 256))
        y = pl.pallas_call(
            _k, out_shape=jax.ShapeDtypeStruct((n, 256), jnp.float32))(x)
        y0 = int(jax.device_get(y[0, 0]))
        if y0 == n - 1:
            return "jnp"
        if y0 == 1:
            return "inv"
        return None
    except Exception:
        return None


# ---------------------------------------------------------------------------
# Kernel
# ---------------------------------------------------------------------------
def convnext_block_kernel(x_ref, halo_ref, wd_ref, bd_ref, g_ref, bln_ref,
                          w1_ref, b1_ref, w2_ref, b2_ref, out_ref, win_ref,
                          *, c_real, hidden_chunk, gelu_dtype, roll_mode):
    # x_ref:    (1, TL, Cp)        main activation block (f32, zero padded)
    # halo_ref: (1, 1, 16, Cp)     8 rows before + 8 rows after the tile
    # wd_ref:   (K, Cp)            depthwise taps; bd/g/bln/b1/b2: (1, *) biases
    # w1_ref:   (Cp, C4p), w2_ref: (C4p, Cp)   pointwise weights (f32 or bf16)
    # out_ref:  (1, TL, Cp)        win_ref: VMEM scratch (TL + 16, Cp)
    tl = out_ref.shape[1]
    c_pad = out_ref.shape[2]
    n_win = tl + 2 * HALO

    # ---- assemble the halo'd window in VMEM (all stores sublane-aligned) ----
    win_ref[0:HALO, :] = halo_ref[0, 0, 0:HALO, :]
    win_ref[HALO:HALO + tl, :] = x_ref[0]
    win_ref[HALO + tl:n_win, :] = halo_ref[0, 0, HALO:2 * HALO, :]
    xw = win_ref[...]                                   # (TL + 16, Cp), f32
    wd = wd_ref[...]                                    # (K, Cp), hoisted load

    # ---- depthwise conv: out[l] = sum_j xw[l + j + 1] * wd[j], j in [0,16) --
    # Taps are grouped by (shift mod 8).  Residue-0 taps (j = 7, 15) use
    # aligned slices; the rest share one XLU roll per residue (7 rolls total).
    acc = xw[8:8 + tl, :] * wd[7:8, :] + xw[16:16 + tl, :] * wd[15:16, :]
    for r in range(1, 8):
        if roll_mode is None:
            lo = xw[r:r + tl, :]                        # fallback: plain slices
            hi = xw[8 + r:8 + r + tl, :]
        else:
            shift = (n_win - r) if roll_mode == "jnp" else r
            rolled = pltpu.roll(xw, shift=shift, axis=0)   # rolled[m] = xw[m + r]
            lo = rolled[0:tl, :]
            hi = rolled[8:8 + tl, :]
        acc = acc + lo * wd[r - 1:r, :] + hi * wd[r + 7:r + 8, :]
    acc = acc + bd_ref[...]

    # ---- LayerNorm over the channel (lane) axis -----------------------------
    # Padded lanes of `acc` are exactly 0 (zero-padded input/taps/bias), so the
    # centered sum-of-squares only needs a (Cp - C) * u^2 correction (those
    # lanes hold d = -u) instead of a lane mask.
    inv_c = 1.0 / float(c_real)
    u = jnp.sum(acc, axis=-1, keepdims=True) * inv_c
    d = acc - u
    ss = jnp.sum(d * d, axis=-1, keepdims=True)
    if c_pad != c_real:
        ss = ss - float(c_pad - c_real) * (u * u)
    xn = d * jax.lax.rsqrt(ss * inv_c + EPS)
    xn = xn * g_ref[...] + bln_ref[...]                 # padded lanes -> 0

    # ---- pointwise conv1 -> GELU -> conv2, chunked along the 4C axis --------
    mxu_dtype = w1_ref.dtype
    xn_mm = xn.astype(mxu_dtype)
    n4 = w1_ref.shape[1]
    y = None
    for s0 in range(0, n4, hidden_chunk):
        s1 = s0 + hidden_chunk
        h = jnp.dot(xn_mm, w1_ref[:, s0:s1], preferred_element_type=jnp.float32)
        h = h + b1_ref[:, s0:s1]
        h = _gelu_exact(h, gelu_dtype)
        part = jnp.dot(h.astype(mxu_dtype), w2_ref[s0:s1, :],
                       preferred_element_type=jnp.float32)
        y = part if y is None else y + part

    # TODO(synk): dropout treated as identity (inference mode).
    out_ref[0] = y + b2_ref[...] + x_ref[0]             # + residual (aligned)


# ---------------------------------------------------------------------------
# Wrapper
# ---------------------------------------------------------------------------
def _vmem_capacity_bytes():
    try:
        info = pltpu.get_tpu_info()
        for name in ("vmem_capacity_bytes", "vmem_bytes", "vmem_size_bytes"):
            v = getattr(info, name, None)
            if v:
                return int(v)
    except Exception:
        pass
    return 64 * 1024 * 1024          # conservative (v7x-sized) default


def _pick_hidden_chunk(c4p, target):
    if c4p <= target:
        return c4p
    n = -(-c4p // target)
    while c4p % n != 0 or (c4p // n) % 128 != 0:
        n += 1
    return c4p // n


def convnext_block(x_bcl, params, *, tile_l=None, mxu_dtype=jnp.bfloat16,
                   gelu_dtype=None, hidden_chunk=1024, vmem_limit_bytes=None):
    """x_bcl: (B, C, L) float32, PyTorch NCL layout.  Returns (B, C, L) float32.

    tile_l / vmem_limit_bytes default from the detected VMEM capacity
    (1024 / 96 MiB on 128-MiB parts v5e/v6e, 512 / 48 MiB on 64-MiB v7x).
    mxu_dtype:  operand dtype of the two 1x1-conv matmuls (f32 accumulation).
    gelu_dtype: VALU dtype of the GELU polynomial (None -> float32; bf16 pays
                off on v6e/v7x, keep f32 on v5e which has no bf16 VPU).
    hidden_chunk: max columns of the 4C intermediate live at once.
    """
    B, C, L = x_bcl.shape
    C4 = 4 * C
    Cp = _round_up(C, 128)
    C4p = _round_up(C4, 128)

    vmem = _vmem_capacity_bytes()
    big_vmem = vmem >= 100 * 1024 * 1024
    if tile_l is None:
        tile_l = 1024 if big_vmem else 512
    if vmem_limit_bytes is None:
        vmem_limit_bytes = (96 if big_vmem else 48) * 1024 * 1024
    if gelu_dtype is None:
        gelu_dtype = jnp.float32

    TL = _round_up(min(tile_l, _round_up(L, 8)), 8)
    nt = -(-L // TL)
    # Keep both TensorCores busy on megacore parts when the grid would
    # otherwise have a single step.
    if B * nt < 2 and L > 8:
        tl2 = _round_up(-(-L // 2), 8)
        if 8 <= tl2 < TL:
            TL = tl2
            nt = -(-L // TL)
    Lout = nt * TL

    # (B, L, C) layout, channels lane-dense; zero-pad L -> Lout, C -> Cp.
    x_nlc = jnp.transpose(x_bcl, (0, 2, 1)).astype(jnp.float32)
    xmain = jnp.pad(x_nlc, ((0, 0), (0, Lout - L), (0, Cp - C)))     # (B, Lout, Cp)

    # Per-tile halo rows (8 before + 8 after each tile) — only ~16/TL of the
    # activation is duplicated; the bulk is streamed straight from xmain.
    starts = jnp.arange(nt, dtype=jnp.int32) * TL
    idx = jnp.concatenate(
        [starts[:, None] - HALO + jnp.arange(HALO, dtype=jnp.int32)[None, :],
         starts[:, None] + TL + jnp.arange(HALO, dtype=jnp.int32)[None, :]],
        axis=1)                                                      # (nt, 16)
    valid = ((idx >= 0) & (idx < L)).astype(jnp.float32)
    halo = xmain[:, jnp.clip(idx, 0, Lout - 1), :] * valid[None, :, :, None]

    # Weights / biases, channel-padded with zeros.
    wd = jnp.pad(jnp.transpose(params["conv_d_w"][:, 0, :], (1, 0)),
                 ((0, 0), (0, Cp - C))).astype(jnp.float32)          # (K, Cp)
    bd = jnp.pad(params["conv_d_b"], (0, Cp - C))[None, :].astype(jnp.float32)
    g = jnp.pad(params["ln_w"], (0, Cp - C))[None, :].astype(jnp.float32)
    bln = jnp.pad(params["ln_b"], (0, Cp - C))[None, :].astype(jnp.float32)
    w1 = jnp.pad(jnp.transpose(params["conv_1_w"][:, :, 0], (1, 0)),
                 ((0, Cp - C), (0, C4p - C4))).astype(mxu_dtype)     # (Cp, C4p)
    b1 = jnp.pad(params["conv_1_b"], (0, C4p - C4))[None, :].astype(jnp.float32)
    w2 = jnp.pad(jnp.transpose(params["conv_2_w"][:, :, 0], (1, 0)),
                 ((0, C4p - C4), (0, Cp - C))).astype(mxu_dtype)     # (C4p, Cp)
    b2 = jnp.pad(params["conv_2_b"], (0, Cp - C))[None, :].astype(jnp.float32)

    kernel = functools.partial(
        convnext_block_kernel,
        c_real=C,
        hidden_chunk=_pick_hidden_chunk(C4p, hidden_chunk),
        gelu_dtype=gelu_dtype,
        roll_mode=_sublane_roll_mode(),
    )

    out = pl.pallas_call(
        kernel,
        out_shape=jax.ShapeDtypeStruct((B, Lout, Cp), jnp.float32),
        grid_spec=pltpu.PrefetchScalarGridSpec(
            num_scalar_prefetch=0,
            grid=(B, nt),
            in_specs=[
                pl.BlockSpec((1, TL, Cp), lambda b, i: (b, i, 0)),
                pl.BlockSpec((1, 1, 2 * HALO, Cp), lambda b, i: (b, i, 0, 0)),
                # Grid-invariant weights (pipeline_mode=pl.Buffered(1) would
                # single-buffer them; left at the default for portability).
                pl.BlockSpec((KSIZE, Cp), lambda b, i: (0, 0)),
                pl.BlockSpec((1, Cp), lambda b, i: (0, 0)),
                pl.BlockSpec((1, Cp), lambda b, i: (0, 0)),
                pl.BlockSpec((1, Cp), lambda b, i: (0, 0)),
                pl.BlockSpec((Cp, C4p), lambda b, i: (0, 0)),
                pl.BlockSpec((1, C4p), lambda b, i: (0, 0)),
                pl.BlockSpec((C4p, Cp), lambda b, i: (0, 0)),
                pl.BlockSpec((1, Cp), lambda b, i: (0, 0)),
            ],
            out_specs=pl.BlockSpec((1, TL, Cp), lambda b, i: (b, i, 0)),
            scratch_shapes=[pltpu.VMEM((TL + 2 * HALO, Cp), jnp.float32)],
        ),
        compiler_params=pltpu.CompilerParams(
            dimension_semantics=("parallel", "parallel"),
            vmem_limit_bytes=vmem_limit_bytes,
        ),
    )(xmain, halo, wd, bd, g, bln, w1, b1, w2, b2)

    out = out[:, :L, :C]                                # drop L / channel padding
    return jnp.transpose(out, (0, 2, 1))                # back to (B, C, L)


# ---------------------------------------------------------------------------
# Pure-JAX reference mirroring the PyTorch module (eval mode).
# ---------------------------------------------------------------------------
def reference_forward(x_bcl, params, mxu_dtype=None):
    B, C, L = x_bcl.shape
    xpad = jnp.pad(x_bcl, ((0, 0), (0, 0), (LEFT_PAD, RIGHT_PAD)))
    y = jnp.zeros_like(x_bcl)
    for j in range(KSIZE):
        y = y + xpad[:, :, j:j + L] * params["conv_d_w"][:, 0, j][None, :, None]
    y = y + params["conv_d_b"][None, :, None]
    u = jnp.mean(y, axis=1, keepdims=True)
    s = jnp.mean((y - u) ** 2, axis=1, keepdims=True)
    y = (y - u) / jnp.sqrt(s + EPS)
    y = params["ln_w"][None, :, None] * y + params["ln_b"][None, :, None]

    w1 = params["conv_1_w"][:, :, 0]
    w2 = params["conv_2_w"][:, :, 0]
    y_mm, w1_mm = (y, w1) if mxu_dtype is None else (y.astype(mxu_dtype),
                                                     w1.astype(mxu_dtype))
    h = jnp.einsum("oc,bcl->bol", w1_mm, y_mm, preferred_element_type=jnp.float32)
    h = h + params["conv_1_b"][None, :, None]
    h = 0.5 * h * (1.0 + jax.scipy.special.erf(h / math.sqrt(2.0)))
    h_mm, w2_mm = (h, w2) if mxu_dtype is None else (h.astype(mxu_dtype),
                                                     w2.astype(mxu_dtype))
    z = jnp.einsum("oc,bcl->bol", w2_mm, h_mm, preferred_element_type=jnp.float32)
    z = z + params["conv_2_b"][None, :, None]
    return z + x_bcl


if __name__ == "__main__":
    B, C, L = 2, 8, 32
    key = jax.random.PRNGKey(0)
    ks = jax.random.split(key, 9)
    params = {
        "conv_d_w": 0.1 * jax.random.normal(ks[0], (C, 1, KSIZE), jnp.float32),
        "conv_d_b": 0.1 * jax.random.normal(ks[1], (C,), jnp.float32),
        "ln_w": 1.0 + 0.1 * jax.random.normal(ks[2], (C,), jnp.float32),
        "ln_b": 0.1 * jax.random.normal(ks[3], (C,), jnp.float32),
        "conv_1_w": 0.1 * jax.random.normal(ks[4], (4 * C, C, 1), jnp.float32),
        "conv_1_b": 0.1 * jax.random.normal(ks[5], (4 * C,), jnp.float32),
        "conv_2_w": 0.1 * jax.random.normal(ks[6], (C, 4 * C, 1), jnp.float32),
        "conv_2_b": 0.1 * jax.random.normal(ks[7], (C,), jnp.float32),
    }
    x = jax.random.normal(ks[8], (B, C, L), jnp.float32)

    # f32-MXU variant: must match the exact reference tightly.
    out_f32 = jax.block_until_ready(convnext_block(x, params, mxu_dtype=jnp.float32))
    # Default (bf16 MXU operands, f32 accumulation, f32 GELU).
    out_bf16 = jax.block_until_ready(convnext_block(x, params))
    # Fast path for bf16-VALU parts (v6e/v7x): bf16 GELU polynomial.
    out_fast = jax.block_until_ready(
        convnext_block(x, params, gelu_dtype=jnp.bfloat16))

    ref = jax.block_until_ready(reference_forward(x, params))
    ref_bf16 = jax.block_until_ready(
        reference_forward(x, params, mxu_dtype=jnp.bfloat16))

    assert out_f32.shape == (B, C, L), out_f32.shape
    assert out_bf16.shape == (B, C, L), out_bf16.shape
    assert jnp.allclose(out_f32, ref, atol=1e-4, rtol=1e-4), (
        float(jnp.max(jnp.abs(out_f32 - ref))))
    assert jnp.allclose(out_bf16, ref_bf16, atol=5e-3, rtol=5e-3), (
        float(jnp.max(jnp.abs(out_bf16 - ref_bf16))))
    assert jnp.allclose(out_bf16, ref, atol=2e-2, rtol=2e-2), (
        float(jnp.max(jnp.abs(out_bf16 - ref))))
    assert jnp.allclose(out_fast, ref_bf16, atol=2e-2, rtol=2e-2), (
        float(jnp.max(jnp.abs(out_fast - ref_bf16))))
    print("KERNEL_OK")
</pallas_src>

<mosaic_0001>
module attributes {stable_mosaic.version = 11 : i64} {
  func.func @_k(%arg0: memref<48x256xf32, #tpu.memory_space<vmem>>, %arg1: memref<48x256xf32, #tpu.memory_space<vmem>>) attributes {dimension_semantics = [], scalar_prefetch = 0 : i64, scratch_operands = 0 : i64, tpu.core_type = #tpu.core_type<tc>} {
    %c0 = arith.constant 0 : index
    %c0_0 = arith.constant 0 : index
    %0 = vector.load %arg0[%c0, %c0_0] : memref<48x256xf32, #tpu.memory_space<vmem>>, vector<48x256xf32>
    %c1_i32 = arith.constant 1 : i32
    %1 = tpu.dynamic_rotate %0 by %c1_i32 dim 0 : vector<48x256xf32>, i32 -> vector<48x256xf32>
    %c0_1 = arith.constant 0 : index
    %c0_2 = arith.constant 0 : index
    %2 = vector.load %arg1[%c0_1, %c0_2] : memref<48x256xf32, #tpu.memory_space<vmem>>, vector<48x256xf32>
    tpu.vector_store %arg1[%c0_1, %c0_2], %1 {strides = array<i32>} : memref<48x256xf32, #tpu.memory_space<vmem>>, vector<48x256xf32>,
    return
  }
}

module attributes {stable_mosaic.version = 11 : i64} {
  func.func @convnext_block_kernel(%arg0: i32, %arg1: i32, %arg2: memref<1x32x128xf32, #tpu.memory_space<vmem>>, %arg3: memref<1x1x16x128xf32, #tpu.memory_space<vmem>>, %arg4: memref<16x128xf32, #tpu.memory_space<vmem>>, %arg5: memref<1x128xf32, #tpu.memory_space<vmem>>, %arg6: memref<1x128xf32, #tpu.memory_space<vmem>>, %arg7: memref<1x128xf32, #tpu.memory_space<vmem>>, %arg8: memref<128x128xf32, #tpu.memory_space<vmem>>, %arg9: memref<1x128xf32, #tpu.memory_space<vmem>>, %arg10: memref<128x128xf32, #tpu.memory_space<vmem>>, %arg11: memref<1x128xf32, #tpu.memory_space<vmem>>, %arg12: memref<1x32x128xf32, #tpu.memory_space<vmem>>, %arg13: memref<48x128xf32, #tpu.memory_space<vmem>>) attributes {dimension_semantics = [#tpu.dimension_semantics<parallel>, #tpu.dimension_semantics<parallel>], iteration_bounds = array<i64: 2, 1>, scalar_prefetch = 0 : i64, scratch_operands = 1 : i64, tpu.core_type = #tpu.core_type<tc>, window_params = [{transform_indices = @transform_0, window_bounds = array<i64: 1, 32, 128>}, {transform_indices = @transform_1, window_bounds = array<i64: 1, 1, 16, 128>}, {pipeline_mode = #tpu.pipeline_mode<synchronous>, transform_indices = @transform_2, window_bounds = array<i64: 16, 128>}, {pipeline_mode = #tpu.pipeline_mode<synchronous>, transform_indices = @transform_3, window_bounds = array<i64: 1, 128>}, {pipeline_mode = #tpu.pipeline_mode<synchronous>, transform_indices = @transform_4, window_bounds = array<i64: 1, 128>}, {pipeline_mode = #tpu.pipeline_mode<synchronous>, transform_indices = @transform_5, window_bounds = array<i64: 1, 128>}, {pipeline_mode = #tpu.pipeline_mode<synchronous>, transform_indices = @transform_6, window_bounds = array<i64: 128, 128>}, {pipeline_mode = #tpu.pipeline_mode<synchronous>, transform_indices = @transform_7, window_bounds = array<i64: 1, 128>}, {pipeline_mode = #tpu.pipeline_mode<synchronous>, transform_indices = @transform_8, window_bounds = array<i64: 128, 128>}, {pipeline_mode = #tpu.pipeline_mode<synchronous>, transform_indices = @transform_9, window_bounds = array<i64: 1, 128>}, {transform_indices = @transform_10, window_bounds = array<i64: 1, 32, 128>}]} {
    %c0 = arith.constant 0 : index
    %c0_0 = arith.constant 0 : index
    %c0_1 = arith.constant 0 : index
    %c0_2 = arith.constant 0 : index
    %0 = vector.load %arg3[%c0, %c0_0, %c0_1, %c0_2] : memref<1x1x16x128xf32, #tpu.memory_space<vmem>>, vector<1x1x8x128xf32>
    %1 = vector.shape_cast %0 : vector<1x1x8x128xf32> to vector<8x128xf32>
    %c0_3 = arith.constant 0 : index
    %c0_4 = arith.constant 0 : index
    %2 = vector.load %arg13[%c0_3, %c0_4] : memref<48x128xf32, #tpu.memory_space<vmem>>, vector<8x128xf32>
    tpu.vector_store %arg13[%c0_3, %c0_4], %1 {strides = array<i32>} : memref<48x128xf32, #tpu.memory_space<vmem>>, vector<8x128xf32>,
    %c0_5 = arith.constant 0 : index
    %c0_6 = arith.constant 0 : index
    %c0_7 = arith.constant 0 : index
    %3 = vector.load %arg2[%c0_5, %c0_6, %c0_7] : memref<1x32x128xf32, #tpu.memory_space<vmem>>, vector<1x32x128xf32>
    %4 = vector.shape_cast %3 : vector<1x32x128xf32> to vector<32x128xf32>
    %c8 = arith.constant 8 : index
    %c0_8 = arith.constant 0 : index
    %5 = vector.load %arg13[%c8, %c0_8] : memref<48x128xf32, #tpu.memory_space<vmem>>, vector<32x128xf32>
    tpu.vector_store %arg13[%c8, %c0_8], %4 {strides = array<i32>} : memref<48x128xf32, #tpu.memory_space<vmem>>, vector<32x128xf32>,
    %c0_9 = arith.constant 0 : index
    %c0_10 = arith.constant 0 : index
    %c8_11 = arith.constant 8 : index
    %c0_12 = arith.constant 0 : index
    %6 = vector.load %arg3[%c0_9, %c0_10, %c8_11, %c0_12] : memref<1x1x16x128xf32, #tpu.memory_space<vmem>>, vector<1x1x8x128xf32>
    %7 = vector.shape_cast %6 : vector<1x1x8x128xf32> to vector<8x128xf32>
    %c40 = arith.constant 40 : index
    %c0_13 = arith.constant 0 : index
    %8 = vector.load %arg13[%c40, %c0_13] : memref<48x128xf32, #tpu.memory_space<vmem>>, vector<8x128xf32>
    tpu.vector_store %arg13[%c40, %c0_13], %7 {strides = array<i32>} : memref<48x128xf32, #tpu.memory_space<vmem>>, vector<8x128xf32>,
    %c0_14 = arith.constant 0 : index
    %c0_15 = arith.constant 0 : index
    %9 = vector.load %arg13[%c0_14, %c0_15] : memref<48x128xf32, #tpu.memory_space<vmem>>, vector<48x128xf32>
    %c0_16 = arith.constant 0 : index
    %c0_17 = arith.constant 0 : index
    %10 = vector.load %arg4[%c0_16, %c0_17] : memref<16x128xf32, #tpu.memory_space<vmem>>, vector<16x128xf32>
    %11 = vector.extract_strided_slice %9 {offsets = [8, 0], sizes = [32, 128], strides = [1, 1]} : vector<48x128xf32> to vector<32x128xf32>
    %12 = vector.extract_strided_slice %10 {offsets = [7, 0], sizes = [1, 128], strides = [1, 1]} : vector<16x128xf32> to vector<1x128xf32>
    %13 = vector.broadcast %12 : vector<1x128xf32> to vector<32x128xf32>
    %14 = arith.mulf %11, %13 : vector<32x128xf32>
    %15 = vector.extract_strided_slice %9 {offsets = [16, 0], sizes = [32, 128], strides = [1, 1]} : vector<48x128xf32> to vector<32x128xf32>
    %16 = vector.extract_strided_slice %10 {offsets = [15, 0], sizes = [1, 128], strides = [1, 1]} : vector<16x128xf32> to vector<1x128xf32>
    %17 = vector.broadcast %16 : vector<1x128xf32> to vector<32x128xf32>
    %18 = arith.mulf %15, %17 : vector<32x128xf32>
    %19 = arith.addf %14, %18 : vector<32x128xf32>
    %20 = vector.extract_strided_slice %9 {offsets = [1, 0], sizes = [32, 128], strides = [1, 1]} : vector<48x128xf32> to vector<32x128xf32>
    %21 = vector.extract_strided_slice %9 {offsets = [9, 0], sizes = [32, 128], strides = [1, 1]} : vector<48x128xf32> to vector<32x128xf32>
    %22 = vector.extract_strided_slice %10 {offsets = [0, 0], sizes = [1, 128], strides = [1, 1]} : vector<16x128xf32> to vector<1x128xf32>
    %23 = vector.broadcast %22 : vector<1x128xf32> to vector<32x128xf32>
    %24 = arith.mulf %20, %23 : vector<32x128xf32>
    %25 = arith.addf %19, %24 : vector<32x128xf32>
    %26 = vector.extract_strided_slice %10 {offsets = [8, 0], sizes = [1, 128], strides = [1, 1]} : vector<16x128xf32> to vector<1x128xf32>
    %27 = vector.broadcast %26 : vector<1x128xf32> to vector<32x128xf32>
    %28 = arith.mulf %21, %27 : vector<32x128xf32>
    %29 = arith.addf %25, %28 : vector<32x128xf32>
    %30 = vector.extract_strided_slice %9 {offsets = [2, 0], sizes = [32, 128], strides = [1, 1]} : vector<48x128xf32> to vector<32x128xf32>
    %31 = vector.extract_strided_slice %9 {offsets = [10, 0], sizes = [32, 128], strides = [1, 1]} : vector<48x128xf32> to vector<32x128xf32>
    %32 = vector.extract_strided_slice %10 {offsets = [1, 0], sizes = [1, 128], strides = [1, 1]} : vector<16x128xf32> to vector<1x128xf32>
    %33 = vector.broadcast %32 : vector<1x128xf32> to vector<32x128xf32>
    %34 = arith.mulf %30, %33 : vector<32x128xf32>
    %35 = arith.addf %29, %34 : vector<32x128xf32>
    %36 = vector.extract_strided_slice %10 {offsets = [9, 0], sizes = [1, 128], strides = [1, 1]} : vector<16x128xf32> to vector<1x128xf32>
    %37 = vector.broadcast %36 : vector<1x128xf32> to vector<32x128xf32>
    %38 = arith.mulf %31, %37 : vector<32x128xf32>
    %39 = arith.addf %35, %38 : vector<32x128xf32>
    %40 = vector.extract_strided_slice %9 {offsets = [3, 0], sizes = [32, 128], strides = [1, 1]} : vector<48x128xf32> to vector<32x128xf32>
    %41 = vector.extract_strided_slice %9 {offsets = [11, 0], sizes = [32, 128], strides = [1, 1]} : vector<48x128xf32> to vector<32x128xf32>
    %42 = vector.extract_strided_slice %10 {offsets = [2, 0], sizes = [1, 128], strides = [1, 1]} : vector<16x128xf32> to vector<1x128xf32>
    %43 = vector.broadcast %42 : vector<1x128xf32> to vector<32x128xf32>
    %44 = arith.mulf %40, %43 : vector<32x128xf32>
    %45 = arith.addf %39, %44 : vector<32x128xf32>
    %46 = vector.extract_strided_slice %10 {offsets = [10, 0], sizes = [1, 128], strides = [1, 1]} : vector<16x128xf32> to vector<1x128xf32>
    %47 = vector.broadcast %46 : vector<1x128xf32> to vector<32x128xf32>
    %48 = arith.mulf %41, %47 : vector<32x128xf32>
    %49 = arith.addf %45, %48 : vector<32x128xf32>
    %50 = vector.extract_strided_slice %9 {offsets = [4, 0], sizes = [32, 128], strides = [1, 1]} : vector<48x128xf32> to vector<32x128xf32>
    %51 = vector.extract_strided_slice %9 {offsets = [12, 0], sizes = [32, 128], strides = [1, 1]} : vector<48x128xf32> to vector<32x128xf32>
    %52 = vector.extract_strided_slice %10 {offsets = [3, 0], sizes = [1, 128], strides = [1, 1]} : vector<16x128xf32> to vector<1x128xf32>
    %53 = vector.broadcast %52 : vector<1x128xf32> to vector<32x128xf32>
    %54 = arith.mulf %50, %53 : vector<32x128xf32>
    %55 = arith.addf %49, %54 : vector<32x128xf32>
    %56 = vector.extract_strided_slice %10 {offsets = [11, 0], sizes = [1, 128], strides = [1, 1]} : vector<16x128xf32> to vector<1x128xf32>
    %57 = vector.broadcast %56 : vector<1x128xf32> to vector<32x128xf32>
    %58 = arith.mulf %51, %57 : vector<32x128xf32>
    %59 = arith.addf %55, %58 : vector<32x128xf32>
    %60 = vector.extract_strided_slice %9 {offsets = [5, 0], sizes = [32, 128], strides = [1, 1]} : vector<48x128xf32> to vector<32x128xf32>
    %61 = vector.extract_strided_slice %9 {offsets = [13, 0], sizes = [32, 128], strides = [1, 1]} : vector<48x128xf32> to vector<32x128xf32>
    %62 = vector.extract_strided_slice %10 {offsets = [4, 0], sizes = [1, 128], strides = [1, 1]} : vector<16x128xf32> to vector<1x128xf32>
    %63 = vector.broadcast %62 : vector<1x128xf32> to vector<32x128xf32>
    %64 = arith.mulf %60, %63 : vector<32x128xf32>
    %65 = arith.addf %59, %64 : vector<32x128xf32>
    %66 = vector.extract_strided_slice %10 {offsets = [12, 0], sizes = [1, 128], strides = [1, 1]} : vector<16x128xf32> to vector<1x128xf32>
    %67 = vector.broadcast %66 : vector<1x128xf32> to vector<32x128xf32>
    %68 = arith.mulf %61, %67 : vector<32x128xf32>
    %69 = arith.addf %65, %68 : vector<32x128xf32>
    %70 = vector.extract_strided_slice %9 {offsets = [6, 0], sizes = [32, 128], strides = [1, 1]} : vector<48x128xf32> to vector<32x128xf32>
    %71 = vector.extract_strided_slice %9 {offsets = [14, 0], sizes = [32, 128], strides = [1, 1]} : vector<48x128xf32> to vector<32x128xf32>
    %72 = vector.extract_strided_slice %10 {offsets = [5, 0], sizes = [1, 128], strides = [1, 1]} : vector<16x128xf32> to vector<1x128xf32>
    %73 = vector.broadcast %72 : vector<1x128xf32> to vector<32x128xf32>
    %74 = arith.mulf %70, %73 : vector<32x128xf32>
    %75 = arith.addf %69, %74 : vector<32x128xf32>
    %76 = vector.extract_strided_slice %10 {offsets = [13, 0], sizes = [1, 128], strides = [1, 1]} : vector<16x128xf32> to vector<1x128xf32>
    %77 = vector.broadcast %76 : vector<1x128xf32> to vector<32x128xf32>
    %78 = arith.mulf %71, %77 : vector<32x128xf32>
    %79 = arith.addf %75, %78 : vector<32x128xf32>
    %80 = vector.extract_strided_slice %9 {offsets = [7, 0], sizes = [32, 128], strides = [1, 1]} : vector<48x128xf32> to vector<32x128xf32>
    %81 = vector.extract_strided_slice %9 {offsets = [15, 0], sizes = [32, 128], strides = [1, 1]} : vector<48x128xf32> to vector<32x128xf32>
    %82 = vector.extract_strided_slice %10 {offsets = [6, 0], sizes = [1, 128], strides = [1, 1]} : vector<16x128xf32> to vector<1x128xf32>
    %83 = vector.broadcast %82 : vector<1x128xf32> to vector<32x128xf32>
    %84 = arith.mulf %80, %83 : vector<32x128xf32>
    %85 = arith.addf %79, %84 : vector<32x128xf32>
    %86 = vector.extract_strided_slice %10 {offsets = [14, 0], sizes = [1, 128], strides = [1, 1]} : vector<16x128xf32> to vector<1x128xf32>
    %87 = vector.broadcast %86 : vector<1x128xf32> to vector<32x128xf32>
    %88 = arith.mulf %81, %87 : vector<32x128xf32>
    %89 = arith.addf %85, %88 : vector<32x128xf32>
    %c0_18 = arith.constant 0 : index
    %c0_19 = arith.constant 0 : index
    %90 = vector.load %arg5[%c0_18, %c0_19] : memref<1x128xf32, #tpu.memory_space<vmem>>, vector<1x128xf32>
    %91 = vector.broadcast %90 : vector<1x128xf32> to vector<32x128xf32>
    %92 = arith.addf %89, %91 : vector<32x128xf32>
    %cst = arith.constant dense<0.000000e+00> : vector<32xf32>
    %93 = vector.multi_reduction <add>, %92, %cst [1] : vector<32x128xf32> to vector<32xf32>
    %94 = vector.shape_cast %93 : vector<32xf32> to vector<32x1xf32>
    %cst_20 = arith.constant 1.250000e-01 : f32
    %95 = vector.broadcast %cst_20 : f32 to vector<32x1xf32>
    %96 = arith.mulf %94, %95 : vector<32x1xf32>
    %97 = vector.broadcast %96 : vector<32x1xf32> to vector<32x128xf32>
    %98 = arith.subf %92, %97 : vector<32x128xf32>
    %99 = arith.mulf %98, %98 : vector<32x128xf32>
    %cst_21 = arith.constant dense<0.000000e+00> : vector<32xf32>
    %100 = vector.multi_reduction <add>, %99, %cst_21 [1] : vector<32x128xf32> to vector<32xf32>
    %101 = vector.shape_cast %100 : vector<32xf32> to vector<32x1xf32>
    %102 = arith.mulf %96, %96 : vector<32x1xf32>
    %cst_22 = arith.constant 1.200000e+02 : f32
    %103 = vector.broadcast %cst_22 : f32 to vector<32x1xf32>
    %104 = arith.mulf %103, %102 : vector<32x1xf32>
    %105 = arith.subf %101, %104 : vector<32x1xf32>
    %cst_23 = arith.constant 1.250000e-01 : f32
    %106 = vector.broadcast %cst_23 : f32 to vector<32x1xf32>
    %107 = arith.mulf %105, %106 : vector<32x1xf32>
    %cst_24 = arith.constant 9.99999997E-7 : f32
    %108 = vector.broadcast %cst_24 : f32 to vector<32x1xf32>
    %109 = arith.addf %107, %108 : vector<32x1xf32>
    %110 = math.rsqrt %109 : vector<32x1xf32>
    %111 = vector.broadcast %110 : vector<32x1xf32> to vector<32x128xf32>
    %112 = arith.mulf %98, %111 : vector<32x128xf32>
    %c0_25 = arith.constant 0 : index
    %c0_26 = arith.constant 0 : index
    %113 = vector.load %arg6[%c0_25, %c0_26] : memref<1x128xf32, #tpu.memory_space<vmem>>, vector<1x128xf32>
    %114 = vector.broadcast %113 : vector<1x128xf32> to vector<32x128xf32>
    %115 = arith.mulf %112, %114 : vector<32x128xf32>
    %c0_27 = arith.constant 0 : index
    %c0_28 = arith.constant 0 : index
    %116 = vector.load %arg7[%c0_27, %c0_28] : memref<1x128xf32, #tpu.memory_space<vmem>>, vector<1x128xf32>
    %117 = vector.broadcast %116 : vector<1x128xf32> to vector<32x128xf32>
    %118 = arith.addf %115, %117 : vector<32x128xf32>
    %c0_29 = arith.constant 0 : index
    %c0_30 = arith.constant 0 : index
    %119 = vector.load %arg8[%c0_29, %c0_30] : memref<128x128xf32, #tpu.memory_space<vmem>>, vector<128x128xf32>
    %cst_31 = arith.constant dense<0.000000e+00> : vector<32x128xf32>
    %120 = tpu.matmul %118, %119, %cst_31 {dimension_numbers = #tpu.dot_dimension_numbers<[1], [0], [0], [1], [0, 0, 1, 1], [], []>} : vector<32x128xf32>, vector<128x128xf32>, vector<32x128xf32> -> vector<32x128xf32>
    %c0_32 = arith.constant 0 : index
    %c0_33 = arith.constant 0 : index
    %121 = vector.load %arg9[%c0_32, %c0_33] : memref<1x128xf32, #tpu.memory_space<vmem>>, vector<1x128xf32>
    %122 = vector.broadcast %121 : vector<1x128xf32> to vector<32x128xf32>
    %123 = arith.addf %120, %122 : vector<32x128xf32>
    %124 = math.absf %123 : vector<32x128xf32>
    %cst_34 = arith.constant 0.707106769 : f32
    %125 = vector.broadcast %cst_34 : f32 to vector<32x128xf32>
    %126 = arith.mulf %124, %125 : vector<32x128xf32>
    %cst_35 = arith.constant 0.327591091 : f32
    %127 = vector.broadcast %cst_35 : f32 to vector<32x128xf32>
    %128 = arith.mulf %126, %127 : vector<32x128xf32>
    %cst_36 = arith.constant 1.000000e+00 : f32
    %129 = vector.broadcast %cst_36 : f32 to vector<32x128xf32>
    %130 = arith.addf %128, %129 : vector<32x128xf32>
    %131 = tpu.reciprocal %130 : vector<32x128xf32> -> vector<32x128xf32>
    %cst_37 = arith.constant 0.53070271 : f32
    %132 = vector.broadcast %cst_37 : f32 to vector<32x128xf32>
    %133 = arith.mulf %132, %131 : vector<32x128xf32>
    %cst_38 = arith.constant -0.72657603 : f32
    %134 = vector.broadcast %cst_38 : f32 to vector<32x128xf32>
    %135 = arith.addf %133, %134 : vector<32x128xf32>
    %136 = arith.mulf %135, %131 : vector<32x128xf32>
    %cst_39 = arith.constant 0.710706889 : f32
    %137 = vector.broadcast %cst_39 : f32 to vector<32x128xf32>
    %138 = arith.addf %136, %137 : vector<32x128xf32>
    %139 = arith.mulf %138, %131 : vector<32x128xf32>
    %cst_40 = arith.constant -0.142248362 : f32
    %140 = vector.broadcast %cst_40 : f32 to vector<32x128xf32>
    %141 = arith.addf %139, %140 : vector<32x128xf32>
    %142 = arith.mulf %141, %131 : vector<32x128xf32>
    %cst_41 = arith.constant 0.127414793 : f32
    %143 = vector.broadcast %cst_41 : f32 to vector<32x128xf32>
    %144 = arith.addf %142, %143 : vector<32x128xf32>
    %145 = arith.mulf %144, %131 : vector<32x128xf32>
    %146 = arith.mulf %126, %126 : vector<32x128xf32>
    %cst_42 = arith.constant 0.000000e+00 : f32
    %147 = vector.broadcast %cst_42 : f32 to vector<32x128xf32>
    %148 = arith.subf %147, %146 : vector<32x128xf32>
    %149 = math.exp %148 : vector<32x128xf32>
    %150 = arith.mulf %145, %149 : vector<32x128xf32>
    %cst_43 = arith.constant 0.000000e+00 : f32
    %151 = vector.broadcast %cst_43 : f32 to vector<32x128xf32>
    %152 = arith.cmpf oge, %123, %151 : vector<32x128xf32>
    %cst_44 = arith.constant 1.000000e+00 : f32
    %153 = vector.broadcast %cst_44 : f32 to vector<32x128xf32>
    %154 = arith.subf %153, %150 : vector<32x128xf32>
    %155 = arith.select %152, %154, %150 : vector<32x128xi1>, vector<32x128xf32>
    %156 = arith.mulf %123, %155 : vector<32x128xf32>
    %c0_45 = arith.constant 0 : index
    %c0_46 = arith.constant 0 : index
    %157 = vector.load %arg10[%c0_45, %c0_46] : memref<128x128xf32, #tpu.memory_space<vmem>>, vector<128x128xf32>
    %cst_47 = arith.constant dense<0.000000e+00> : vector<32x128xf32>
    %158 = tpu.matmul %156, %157, %cst_47 {dimension_numbers = #tpu.dot_dimension_numbers<[1], [0], [0], [1], [0, 0, 1, 1], [], []>} : vector<32x128xf32>, vector<128x128xf32>, vector<32x128xf32> -> vector<32x128xf32>
    %c0_48 = arith.constant 0 : index
    %c0_49 = arith.constant 0 : index
    %159 = vector.load %arg11[%c0_48, %c0_49] : memref<1x128xf32, #tpu.memory_space<vmem>>, vector<1x128xf32>
    %160 = vector.broadcast %159 : vector<1x128xf32> to vector<32x128xf32>
    %161 = arith.addf %158, %160 : vector<32x128xf32>
    %c0_50 = arith.constant 0 : index
    %c0_51 = arith.constant 0 : index
    %c0_52 = arith.constant 0 : index
    %162 = vector.load %arg2[%c0_50, %c0_51, %c0_52] : memref<1x32x128xf32, #tpu.memory_space<vmem>>, vector<1x32x128xf32>
    %163 = vector.shape_cast %162 : vector<1x32x128xf32> to vector<32x128xf32>
    %164 = arith.addf %161, %163 : vector<32x128xf32>
    %c0_53 = arith.constant 0 : index
    %c0_54 = arith.constant 0 : index
    %c0_55 = arith.constant 0 : index
    %165 = vector.load %arg12[%c0_53, %c0_54, %c0_55] : memref<1x32x128xf32, #tpu.memory_space<vmem>>, vector<1x32x128xf32>
    %166 = vector.shape_cast %165 : vector<1x32x128xf32> to vector<32x128xf32>
    %167 = vector.shape_cast %164 : vector<32x128xf32> to vector<1x32x128xf32>
    tpu.vector_store %arg12[%c0_53, %c0_54, %c0_55], %167 {strides = array<i32>} : memref<1x32x128xf32, #tpu.memory_space<vmem>>, vector<1x32x128xf32>,
    return
  }
  func.func @transform_0(%arg0: i32, %arg1: i32) -> (i32, i32, i32) {
    %c0_i32 = arith.constant 0 : i32
    %c0_i32_0 = arith.constant 0 : i32
    return %arg0, %arg1, %c0_i32 : i32, i32, i32
  }
  func.func @transform_1(%arg0: i32, %arg1: i32) -> (i32, i32, i32, i32) {
    %c0_i32 = arith.constant 0 : i32
    %c0_i32_0 = arith.constant 0 : i32
    %c0_i32_1 = arith.constant 0 : i32
    return %arg0, %arg1, %c0_i32, %c0_i32_0 : i32, i32, i32, i32
  }
  func.func @transform_2(%arg0: i32, %arg1: i32) -> (i32, i32) {
    %c0_i32 = arith.constant 0 : i32
    %c0_i32_0 = arith.constant 0 : i32
    %c0_i32_1 = arith.constant 0 : i32
    return %c0_i32, %c0_i32_0 : i32, i32
  }
  func.func @transform_3(%arg0: i32, %arg1: i32) -> (i32, i32) {
    %c0_i32 = arith.constant 0 : i32
    %c0_i32_0 = arith.constant 0 : i32
    %c0_i32_1 = arith.constant 0 : i32
    return %c0_i32, %c0_i32_0 : i32, i32
  }
  func.func @transform_4(%arg0: i32, %arg1: i32) -> (i32, i32) {
    %c0_i32 = arith.constant 0 : i32
    %c0_i32_0 = arith.constant 0 : i32
    %c0_i32_1 = arith.constant 0 : i32
    return %c0_i32, %c0_i32_0 : i32, i32
  }
  func.func @transform_5(%arg0: i32, %arg1: i32) -> (i32, i32) {
    %c0_i32 = arith.constant 0 : i32
    %c0_i32_0 = arith.constant 0 : i32
    %c0_i32_1 = arith.constant 0 : i32
    return %c0_i32, %c0_i32_0 : i32, i32
  }
  func.func @transform_6(%arg0: i32, %arg1: i32) -> (i32, i32) {
    %c0_i32 = arith.constant 0 : i32
    %c0_i32_0 = arith.constant 0 : i32
    %c0_i32_1 = arith.constant 0 : i32
    return %c0_i32, %c0_i32_0 : i32, i32
  }
  func.func @transform_7(%arg0: i32, %arg1: i32) -> (i32, i32) {
    %c0_i32 = arith.constant 0 : i32
    %c0_i32_0 = arith.constant 0 : i32
    %c0_i32_1 = arith.constant 0 : i32
    return %c0_i32, %c0_i32_0 : i32, i32
  }
  func.func @transform_8(%arg0: i32, %arg1: i32) -> (i32, i32) {
    %c0_i32 = arith.constant 0 : i32
    %c0_i32_0 = arith.constant 0 : i32
    %c0_i32_1 = arith.constant 0 : i32
    return %c0_i32, %c0_i32_0 : i32, i32
  }
  func.func @transform_9(%arg0: i32, %arg1: i32) -> (i32, i32) {
    %c0_i32 = arith.constant 0 : i32
    %c0_i32_0 = arith.constant 0 : i32
    %c0_i32_1 = arith.constant 0 : i32
    return %c0_i32, %c0_i32_0 : i32, i32
  }
  func.func @transform_10(%arg0: i32, %arg1: i32) -> (i32, i32, i32) {
    %c0_i32 = arith.constant 0 : i32
    %c0_i32_0 = arith.constant 0 : i32
    return %arg0, %arg1, %c0_i32 : i32, i32, i32
  }
}

</mosaic_0001>

<bundles_post_ra>
// kernel: tpu_custom_call.1
= control target key start
LH: loop header
LB: loop body
LE: loop exit
PB: predicated region body
PF: predicated region fallthrough
CT: control target
= control target key end

     0   :  { %6 = vsyncpa [#allocation3], 0  ;;  %s199_s0 = inlined_call_operand.hbm [shape: f32[48,256], index: 0, kind: input, shape index: {}]   ;;  %s200_s1 = inlined_call_operand.hbm [shape: f32[48,256], index: 1, kind: output, shape index: {}]  }
   0x1   :  { %7 = vsyncpa [#allocation4], 0  ;;  %s143_s6 = smov [#allocation2]   ;;  %s95_s10 = scalar_lea.hbm %s199_s0, 1536 }
   0x2   :  { %s13_s7 = sshll.u32 %s143_s6, 4  ;;  %p96_p0 = scmp.ne.s32.totalorder %s199_s0, %s95_s10  ;;  %s14_s7 = int_to_ptr.vmem [resolvable:$true] %s13_s7 }
   0x3   :  { %p99_p1 = scmp.lt.u32.totalorder %s95_s10, %s199_s0 }
   0x5   :  { %p101_p2 = pnand %p99_p1, %p96_p0 }
   0x7   :  { %104 = shalt.err (!%p101_p2)
}
   0x8   :  { %s105_s15 = scalar_lea.vmem %s14_s7, 1536  ;;  %p110_p4 = scmp.lt.s32.totalorder %s14_s7, %s14_s7 }
   0x9   :  { %p106_p3 = scmp.ne.s32.totalorder %s14_s7, %s105_s15  ;;  %p111_p5 = scmp.lt.s32.totalorder %s105_s15, %s105_s15 }
   0xb   :  { %p112_p6 = por %p111_p5, %p110_p4 }
   0xd   :  { %p113_p7 = pnand %p112_p6, %p106_p3 }
   0xf   :  { %116 = shalt.err (!%p113_p7)
}
  0x10   :  { %s144_s16 = smov 256   ;;  %s145_s17 = smov 16  }
  0x11   :  { %19 = dma.hbm_to_vmem [thread:$0]  %s199_s0, 1536, %s14_s7, [#allocation3], %s144_s16, %s144_s16, %s145_s17  }
  0x12   :  { %139 = dma.done.wait [#allocation3], 1536  }
  0x13   :  { %140 = vsyncadd [#allocation3], 4294965760  ;;  %v47_v0 = vlaneseq  ;;  %v23_v2 = vld [vmem:[#allocation2] sm:$0xff]  ;;  %v33_v3 = vld [vmem:[#allocation2 + $0x50] sm:$0xff]  ;;  %s146_s0 = smov [#allocation5]  }
  0x14   :  { %v24_v4 = vld [vmem:[#allocation2 + $0x8] sm:$0xff]  ;;  %v35_v5 = vrot.slane %v23_v2, 7  ;;  %v45_v6 = vrot.slane %v33_v3, 7  ;;  %v34_v7 = vld [vmem:[#allocation2 + $0x58] sm:$0xff]  ;;  %v25_v9 = vld [vmem:[#allocation2 + $0x10] sm:$0xff]  ;;  %s79_s20 = sshll.u32 %s146_s0, 4  ;;  %s80_s20 = int_to_ptr.vmem [resolvable:$true] %s79_s20 }
  0x15   :  { %v48_v1 = vshrl.u32 %v47_v0, 7  ;;  %v36_v8 = vrot.slane %v24_v4, 7  ;;  %v26_v10 = vld [vmem:[#allocation2 + $0x18] sm:$0xff]  ;;  %v46_v11 = vrot.slane %v34_v7, 7  ;;  %v37_v12 = vrot.slane %v25_v9, 7  ;;  %v27_v14 = vld [vmem:[#allocation2 + $0x20] sm:$0xff]  ;;  %p122_p9 = scmp.lt.s32.totalorder %s80_s20, %s80_s20 }
  0x16   :  { %v38_v13 = vrot.slane %v26_v10, 7  ;;  %v28_v15 = vld [vmem:[#allocation2 + $0x28] sm:$0xff]  ;;  %v29_v16 = vld [vmem:[#allocation2 + $0x30] sm:$0xff]  ;;  %v39_v18 = vrot.slane %v27_v14, 7  ;;  %v30_v21 = vld [vmem:[#allocation2 + $0x38] sm:$0xff]  ;;  %s117_s21 = scalar_lea.vmem %s80_s20, 1536 }
  0x17   :  { %vm49_vm0 = vcmp.lt.s32.totalorder %v48_v1, 1  ;;  %v40_v19 = vrot.slane %v28_v15, 7  ;;  %v41_v20 = vrot.slane %v29_v16, 7  ;;  %v31_v22 = vld [vmem:[#allocation2 + $0x40] sm:$0xff]  ;;  %v32_v23 = vld [vmem:[#allocation2 + $0x48] sm:$0xff]  ;;  %v42_v27 = vrot.slane %v30_v21, 7  ;;  %p118_p8 = scmp.ne.s32.totalorder %s80_s20, %s117_s21  ;;  %p123_p10 = scmp.lt.s32.totalorder %s117_s21, %s117_s21 }
  0x18   :  { %v60_v17 = vsel %vm49_vm0, %v45_v6, %v35_v5  ;;  %v61_v24 = vsel %vm49_vm0, %v46_v11, %v36_v8  ;;  %v58_v25 = vsel %vm49_vm0, %v35_v5, %v37_v12  ;;  %v59_v26 = vsel %vm49_vm0, %v36_v8, %v38_v13 }
  0x19   :  { %62 = vst [vmem:[#allocation5] sm:$0xff] %v60_v17  ;;  %63 = vst [vmem:[#allocation5 + $0x8] sm:$0xff] %v61_v24  ;;  %v56_v28 = vsel %vm49_vm0, %v37_v12, %v39_v18  ;;  %v57_v29 = vsel %vm49_vm0, %v38_v13, %v40_v19  ;;  %v54_v30 = vsel %vm49_vm0, %v39_v18, %v41_v20  ;;  %v43_v31 = vrot.slane %v31_v22, 7  ;;  %p124_p11 = por %p123_p10, %p122_p9 }
  0x1a   :  { %64 = vst [vmem:[#allocation5 + $0x10] sm:$0xff] %v58_v25  ;;  %65 = vst [vmem:[#allocation5 + $0x18] sm:$0xff] %v59_v26  ;;  %v55_v32 = vsel %vm49_vm0, %v40_v19, %v42_v27  ;;  %v44_v33 = vrot.slane %v32_v23, 7 }
  0x1b   :  { %66 = vst [vmem:[#allocation5 + $0x20] sm:$0xff] %v56_v28  ;;  %67 = vst [vmem:[#allocation5 + $0x28] sm:$0xff] %v57_v29  ;;  %v52_v34 = vsel %vm49_vm0, %v41_v20, %v43_v31  ;;  %v50_v35 = vsel %vm49_vm0, %v43_v31, %v45_v6  ;;  %p125_p12 = pnand %p124_p11, %p118_p8 }
  0x1c   :  { %68 = vst [vmem:[#allocation5 + $0x30] sm:$0xff] %v54_v30  ;;  %69 = vst [vmem:[#allocation5 + $0x38] sm:$0xff] %v55_v32  ;;  %v53_v36 = vsel %vm49_vm0, %v42_v27, %v44_v33  ;;  %v51_v37 = vsel %vm49_vm0, %v44_v33, %v46_v11 }
  0x1d   :  { %70 = vst [vmem:[#allocation5 + $0x40] sm:$0xff] %v52_v34  ;;  %72 = vst [vmem:[#allocation5 + $0x50] sm:$0xff] %v50_v35 }
  0x1e   :  { %71 = vst [vmem:[#allocation5 + $0x48] sm:$0xff] %v53_v36  ;;  %73 = vst [vmem:[#allocation5 + $0x58] sm:$0xff] %v51_v37 }
  0x1f   :  { %128 = shalt.err (!%p125_p12)
}
  0x20   :  { %s129_s24 = scalar_lea.hbm %s200_s1, 1536 }
  0x21   :  { %p130_p13 = scmp.ne.s32.totalorder %s200_s1, %s129_s24  ;;  %p133_p0 = scmp.lt.u32.totalorder %s129_s24, %s200_s1 }
  0x23   :  { %p135_p1 = pnand %p133_p0, %p130_p13 }
  0x25   :  { %138 = shalt.err (!%p135_p1)
}
  0x26   :  { %85 = dma.vmem_to_hbm [thread:$0]  %s80_s20, 1536, %s200_s1, [#allocation4], %s144_s16, %s144_s16, %s145_s17  }
  0x27   :  { %141 = dma.done.wait [#allocation4], 1536  }
  0x28   :  { %142 = vsyncadd [#allocation4], 4294965760 }
  0x29   :  { %89 = vsyncpa [#allocation3], 1 }
  0x2a   :  { %90 = vsyncpa [#allocation4], 1 }

// kernel: tpu_custom_call.1
= control target key start
LH: loop header
LB: loop body
LE: loop exit
PB: predicated region body
PF: predicated region fallthrough
CT: control target
= control target key end

     0   :  { %s3190_s0 = inlined_call_operand.hbm [shape: f32[2,32,128], index: 0, kind: input, shape index: {}]   ;;  %s3191_s1 = inlined_call_operand.hbm [shape: f32[2,1,16,128], index: 1, kind: input, shape index: {}]   ;;  %s3192_s2 = inlined_call_operand.hbm [shape: f32[16,128], index: 2, kind: input, shape index: {}]   ;;  %s3193_s3 = inlined_call_operand.vmem [shape: f32[1,128], index: 3, kind: input, shape index: {}]   ;;  %s3194_s4 = inlined_call_operand.vmem [shape: f32[1,128], index: 4, kind: input, shape index: {}]   ;;  %s3195_s5 = inlined_call_operand.vmem [shape: f32[1,128], index: 5, kind: input, shape index: {}]   ;;  %s3196_s6 = inlined_call_operand.hbm [shape: f32[128,128], index: 6, kind: input, shape index: {}]   ;;  %s3197_s7 = inlined_call_operand.vmem [shape: f32[1,128], index: 7, kind: input, shape index: {}]   ;;  %s3198_s8 = inlined_call_operand.hbm [shape: f32[128,128], index: 8, kind: input, shape index: {}]   ;;  %s3199_s9 = inlined_call_operand.vmem [shape: f32[1,128], index: 9, kind: input, shape index: {}]   ;;  %s3200_s10 = inlined_call_operand.hbm [shape: f32[2,32,128], index: 10, kind: output, shape index: {}]  }
   0x1   :  { %3256 = sst [smem:[#allocation36_spill]] %s3190_s0 }
   0x2   :  { %3257 = sst [smem:[#allocation37_spill]] %s3192_s2 }
   0x3   :  { %3258 = sst [smem:[#allocation38_spill]] %s3196_s6 }
   0x4   :  { %3259 = sst [smem:[#allocation39_spill]] %s3197_s7 }
   0x5   :  { %3260 = sst [smem:[#allocation40_spill]] %s3198_s8 }
   0x6   :  { %3261 = sst [smem:[#allocation41_spill]] %s3199_s9 }
   0x7   :  { %3262 = sst [smem:[#allocation42_spill]] %s3200_s10 }
   0x8   :  { %15 = vsyncpa [#allocation4], 0 }
   0x9   :  { %17 = vsyncpa [#allocation4 + $0x1], 0 }
   0xa   :  { %18 = vsyncpa [#allocation7], 0 }
   0xb   :  { %20 = vsyncpa [#allocation7 + $0x1], 0 }
   0xc   :  { %21 = vsyncpa [#allocation10], 0 }
   0xd   :  { %22 = vsyncpa [#allocation5], 0 }
   0xe   :  { %24 = vsyncpa [#allocation5 + $0x1], 0  ;;  %s2176_s13 = smov 0   ;;  %s2178_s14 = smov 0  }
   0xf   :  { %s2180_s15 = smov 0   ;;  %s2182_s16 = smov 0  }
  0x10   :  { %s2184_s17 = smov 0   ;;  %s2186_s18 = smov 0  }
  0x11 LB: > { %3263 = sst [smem:[#allocation18_spill]] %s2089_s13  ;;  %s2207_s19 = sadd.s32 4294967295, %s2109_s18   ;;  %s2109_s18 = sphi %s2186_s18, %s30_s18   ;;  %s2105_s17 = sphi %s2184_s17, %s3383_s17   ;;  %s2101_s16 = sphi %s2182_s16, %s3382_s16   ;;  %s2097_s15 = sphi %s2180_s15, %s3381_s15   ;;  %s2093_s14 = sphi %s2178_s14, %s3380_s14   ;;  %s2089_s13 = sphi %s2176_s13, %s3379_s13  }
  0x12   : > { %3264 = sst [smem:[#allocation19_spill]] %s2101_s16  ;;  %s1533_s20 = sadd.s32 4294967294, %s2109_s18  }
  0x13   : > { %p64_p0 = scmp.ne.s32.totalorder %s2093_s14, %s2089_s13  ;;  %p3203_p1 = scmp.eq.s32.totalorder %s2207_s19, 0 }
  0x14   : > { %p292_p3 = scmp.eq.s32.totalorder %s1533_s20, 1  ;;  %p1534_p5 = scmp.ge.s32.totalorder %s2109_s18, 1 }
  0x15   : > { %p2216_p4 = por %p3203_p1, %p64_p0  ;;  %p299_p7 = scmp.lt.s32.totalorder %s2109_s18, 3 }
  0x16   : > { %p2221_p6 = por %p292_p3, %p64_p0  ;;  %s2111_s24 = smov [#allocation8]  }
  0x17   : > { %s3265_s21 = scalar_select %p2216_p4, 1, 0 }
  0x18   : > { %s3266_s22 = scalar_select %p2221_p6, 1, 0 }
  0x19   : > { %p2226_p8 = pnand %p1534_p5, %p299_p7  ;;  %s311_s25 = sshll.u32 %s2111_s24, 4  ;;  %s2230_s25 = int_to_ptr.vmem [resolvable:$true] %s311_s25 }
  0x1a   : > { %3267 = sst [smem:[#allocation20_spill]] %s3266_s22  ;;  %s2112_s27 = smov [#allocation9]  }
  0x1b   : > { %s3268_s23 = scalar_select %p2226_p8, 1, 0 }
  0x1c   : > { %p1763_p9 = pneg %p2226_p8  ;;  %s333_s28 = sshll.u32 %s2112_s27, 4  ;;  %s2241_s28 = int_to_ptr.vmem [resolvable:$true] %s333_s28 }
  0x1d   : > { %s2113_s29 = smov [#allocation11]   ;;  %s3270_s2 = sld [smem:[#allocation37_spill]] }
  0x1e   : > { %p2237_p11 = pnand %p1763_p9, %p3203_p1  ;;  %s2243_s30 = sshll.u32 %s2113_s29, 4  ;;  %s350_s30 = int_to_ptr.vmem [resolvable:$true] %s2243_s30 }
  0x20   : > { %p2253_p13 = pneg %p2237_p11 }
  0x23   : > { %s1871_s20 = scalar_lea.hbm %s3270_s2, 256 }
  0x24   : > { %p1872_p12 = scmp.ne.s32.totalorder %s3270_s2, %s1871_s20  ;;  %p1878_p5 = scmp.lt.u32.totalorder %s1871_s20, %s3270_s2 }
  0x26   : > { %p1874_p0 = pnand %p2253_p13, %p1872_p12 }
  0x28   : > { %p1875_p3 = pneg %p1874_p0 }
  0x2a   : > { %p1880_p7 = pnand %p1878_p5, %p1875_p3 }
  0x2c   : > { %1883 = shalt.err (!%p1880_p7)
}
  0x2d   : > { %s1884_s22 = scalar_lea.vmem %s2230_s25, 256  ;;  %p1892_p2 = scmp.lt.s32.totalorder %s2230_s25, %s2230_s25 }
  0x2e   : > { %p1885_p9 = scmp.ne.s32.totalorder %s2230_s25, %s1884_s22  ;;  %p1893_p6 = scmp.lt.s32.totalorder %s1884_s22, %s1884_s22 }
  0x30   : > { %p1887_p10 = pnand %p1885_p9, %p2253_p13  ;;  %p1894_p12 = por %p1893_p6, %p1892_p2 }
  0x32   : > { %p1888_p1 = pneg %p1887_p10 }
  0x34   : > { %p1895_p0 = pnand %p1894_p12, %p1888_p1 }
  0x36   : > { %1898 = shalt.err (!%p1895_p0)
}
  0x37   : > { %s3207_s11 = smov 128   ;;  %s3209_s12 = smov 8  }
  0x38   : > { %1766 = dma.hbm_to_vmem [thread:$0]  (!%p2237_p11), %s3270_s2, 256, %s2230_s25, [#allocation7], %s3207_s11, %s3207_s11, %s3209_s12  }
  0x39   : > { %s3272_s6 = sld [smem:[#allocation38_spill]] }
  0x3f   : > { %s1899_s22 = scalar_lea.hbm %s3272_s6, 2048 }
  0x40   : > { %p1900_p1 = scmp.ne.s32.totalorder %s3272_s6, %s1899_s22  ;;  %p1906_p10 = scmp.lt.u32.totalorder %s1899_s22, %s3272_s6 }
  0x42   : > { %p1902_p2 = pnand %p1900_p1, %p2253_p13 }
  0x44   : > { %p1903_p6 = pneg %p1902_p2 }
  0x46   : > { %p1908_p3 = pnand %p1906_p10, %p1903_p6 }
  0x48   : > { %1911 = shalt.err (!%p1908_p3)
}
  0x49   : > { %s1912_s25 = scalar_lea.vmem %s2241_s28, 2048  ;;  %p1920_p12 = scmp.lt.s32.totalorder %s2241_s28, %s2241_s28 }
  0x4a   : > { %p1913_p5 = scmp.ne.s32.totalorder %s2241_s28, %s1912_s25  ;;  %p1921_p0 = scmp.lt.s32.totalorder %s1912_s25, %s1912_s25 }
  0x4c   : > { %p1915_p7 = pnand %p1913_p5, %p2253_p13  ;;  %p1922_p1 = por %p1921_p0, %p1920_p12 }
  0x4e   : > { %p1916_p9 = pneg %p1915_p7 }
  0x50   : > { %p1923_p2 = pnand %p1922_p1, %p1916_p9 }
  0x52   : > { %1926 = shalt.err (!%p1923_p2)
}
  0x53   : > { %1769 = dma.hbm_to_vmem [thread:$0]  (!%p2237_p11), %s3272_s6, 2048, %s2241_s28, [#allocation10], %s3207_s11, %s3207_s11, %s3209_s12  }
  0x54   : > { %s3273_s8 = sld [smem:[#allocation40_spill]] }
  0x5a   : > { %s1927_s20 = scalar_lea.hbm %s3273_s8, 2048 }
  0x5b   : > { %p1928_p6 = scmp.ne.s32.totalorder %s3273_s8, %s1927_s20  ;;  %p1934_p5 = scmp.lt.u32.totalorder %s1927_s20, %s3273_s8 }
  0x5d   : > { %p1930_p10 = pnand %p1928_p6, %p2253_p13 }
  0x5f   : > { %p1931_p3 = pneg %p1930_p10 }
  0x61   : > { %p1936_p7 = pnand %p1934_p5, %p1931_p3 }
  0x63   : > { %1939 = shalt.err (!%p1936_p7)
}
  0x64   : > { %s1940_s25 = scalar_lea.vmem %s350_s30, 2048  ;;  %p1948_p1 = scmp.lt.s32.totalorder %s350_s30, %s350_s30 }
  0x65   : > { %p1941_p9 = scmp.ne.s32.totalorder %s350_s30, %s1940_s25  ;;  %p1949_p2 = scmp.lt.s32.totalorder %s1940_s25, %s1940_s25 }
  0x67   : > { %p1943_p12 = pnand %p1941_p9, %p2253_p13  ;;  %p1950_p4 = por %p1949_p2, %p1948_p1 }
  0x69   : > { %p1944_p0 = pneg %p1943_p12 }
  0x6b   : > { %p1951_p8 = pnand %p1950_p4, %p1944_p0 }
  0x6d   : > { %1954 = shalt.err (!%p1951_p8)
}
  0x6e   : > { %1772 = dma.hbm_to_vmem [thread:$0]  (!%p2237_p11), %s3273_s8, 2048, %s350_s30, [#allocation10], %s3207_s11, %s3207_s11, %s3209_s12  }
  0x6f   : > { %s51_s13 = sadd.s32 1, %s2097_s15  ;;  %s42_s26 = sadd.s32 1, %s2105_s17 }
  0x70   : > { %p58_p4 = scmp.ne.s32.totalorder %s2097_s15, %s2093_s14  ;;  %p44_p8 = scmp.ge.s32.totalorder %s42_s26, 2 }
  0x71   : > { %p59_p13 = scmp.eq.s32.totalorder %s2109_s18, 0  ;;  %p3274_p6 = scmp.eq.s32.totalorder %s2207_s19, 1 }
  0x72   : > { %p1787_p3 = scmp.lt.s32.totalorder %s2109_s18, 2  ;;  %s3385_s26 = smov (%p44_p8, %s42_s26), 0 }
  0x73   : > { %p2332_p10 = por %p3274_p6, %p58_p4  ;;  %p60_p5 = por %p59_p13, %p58_p4 }
  0x74   : > { %s2340_s10 = sand.u32 1, %s2097_s15   ;;  %s46_s30 = ssub.s32 %s2105_s17, %s3385_s26 }
  0x75   : > { %p49_p11 = scmp.eq.s32.totalorder %s46_s30, 0  ;;  %s1539_s16 = sshll.u32 %s2340_s10, 5 }
  0x76   : > { %s1562_s20 = sshll.u32 %s2105_s17, 9  ;;  %s3276_s0 = sld [smem:[#allocation36_spill]] }
  0x77   : > { %s2347_s24 = scalar_select %p49_p11, %s2097_s15, %s51_s13  }
  0x78   : > { %s370_s25 = scalar_lea.vmem [#allocation3], %s1539_s16  ;;  %p2358_p7 = pnand %p1787_p3, %p60_p5 }
  0x79   : > { %s379_s28 = sshll.u32 %s370_s25, 4  ;;  %s1542_s30 = sshll.u32 %s2340_s10, 4  ;;  %s2354_s28 = int_to_ptr.vmem [resolvable:$true] %s379_s28 }
  0x7a   : > { %s367_s27 = scalar_lea.sflag [#allocation4], %s2340_s10  ;;  %p1957_p12 = pneg %p2358_p7 }
  0x7c   : > { %s2352_s22 = scalar_lea.hbm %s3276_s0, %s1562_s20  ;;  %s1960_s25 = scalar_lea.hbm %s3276_s0, 1024 }
  0x7d   : > { %s1955_s20 = scalar_lea.hbm %s2352_s22, 512  ;;  %p1961_p2 = scmp.lt.u32.totalorder %s2352_s22, %s3276_s0 }
  0x7e   : > { %p1956_p9 = scmp.ne.s32.totalorder %s2352_s22, %s1955_s20  ;;  %p1962_p4 = scmp.lt.u32.totalorder %s1960_s25, %s1955_s20 }
  0x7f   : > { %p1964_p13 = scmp.lt.u32.totalorder %s1955_s20, %s2352_s22 }
  0x80   : > { %p1958_p0 = pnand %p1957_p12, %p1956_p9  ;;  %p1963_p8 = por %p1962_p4, %p1961_p2 }
  0x82   : > { %p1959_p1 = pneg %p1958_p0  ;;  %p1965_p6 = por %p1964_p13, %p1963_p8 }
  0x84   : > { %p1966_p3 = pnand %p1965_p6, %p1959_p1 }
  0x86   : > { %1969 = shalt.err (!%p1966_p3)
}
  0x87   : > { %s1970_s13 = scalar_lea.vmem %s2354_s28, 512  ;;  %s2116_s16 = smov [#allocation3]  }
  0x88   : > { %p1971_p5 = scmp.ne.s32.totalorder %s2354_s28, %s1970_s13  ;;  %s1975_s29 = sshll.u32 %s2116_s16, 4  ;;  %s1976_s29 = int_to_ptr.vmem [resolvable:$false] %s1975_s29 }
  0x89   : > { %s1977_s11 = scalar_lea.vmem %s1976_s29, 1024  ;;  %p1978_p0 = scmp.lt.s32.totalorder %s2354_s28, %s1976_s29 }
  0x8a   : > { %p1973_p11 = pnand %p1971_p5, %p1957_p12  ;;  %p1979_p2 = scmp.lt.s32.totalorder %s1977_s11, %s1970_s13 }
  0x8c   : > { %p1974_p9 = pneg %p1973_p11  ;;  %p1980_p4 = por %p1979_p2, %p1978_p0 }
  0x8e   : > { %p1981_p8 = pnand %p1980_p4, %p1974_p9 }
  0x90   : > { %1984 = shalt.err (!%p1981_p8)
}
  0x91   : > { %s3278_s12 = smov 8   ;;  %s3279_s20 = smov 128  }
  0x92   : > { %1776 = dma.hbm_to_vmem [thread:$0]  (!%p2358_p7), %s2352_s22, 512, %s2354_s28, %s367_s27, %s3279_s20, %s3279_s20, %s3278_s12  }
  0x93   : > { %s1563_s25 = sshll.u32 %s2105_s17, 8  ;;  %s393_s11 = scalar_lea.vmem [#allocation6], %s1542_s30 }
  0x94   : > { %s2399_s29 = scalar_lea.hbm %s3191_s1, %s1563_s25  ;;  %s402_s0 = sshll.u32 %s393_s11, 4  ;;  %s2403_s0 = int_to_ptr.vmem [resolvable:$true] %s402_s0 }
  0x95   : > { %s3280_s2 = sand.u32 1, %s2109_s18   ;;  %s1985_s8 = scalar_lea.hbm %s2399_s29, 256 }
  0x96   : > { %s2407_s6 = scalar_lea.sflag [#allocation7], %s3280_s2  ;;  %p1986_p1 = scmp.ne.s32.totalorder %s2399_s29, %s1985_s8 }
  0x97   : > { %s1990_s10 = scalar_lea.hbm %s3191_s1, 512  ;;  %p1991_p3 = scmp.lt.u32.totalorder %s2399_s29, %s3191_s1 }
  0x98   : > { %p1988_p13 = pnand %p1986_p1, %p1957_p12  ;;  %p1992_p5 = scmp.lt.u32.totalorder %s1990_s10, %s1985_s8 }
  0x99   : > { %p1994_p9 = scmp.lt.u32.totalorder %s1985_s8, %s2399_s29 }
  0x9a   : > { %p1989_p6 = pneg %p1988_p13  ;;  %p1993_p11 = por %p1992_p5, %p1991_p3 }
  0x9c   : > { %p1995_p0 = por %p1994_p9, %p1993_p11 }
  0x9e   : > { %p1996_p2 = pnand %p1995_p0, %p1989_p6 }
  0xa0   : > { %1999 = shalt.err (!%p1996_p2)
}
  0xa1   : > { %s2000_s2 = scalar_lea.vmem %s2403_s0, 256  ;;  %s2117_s30 = smov [#allocation6]  }
  0xa2   : > { %p2001_p4 = scmp.ne.s32.totalorder %s2403_s0, %s2000_s2  ;;  %s2005_s16 = sshll.u32 %s2117_s30, 4  ;;  %s2006_s16 = int_to_ptr.vmem [resolvable:$false] %s2005_s16 }
  0xa3   : > { %s2007_s13 = scalar_lea.vmem %s2006_s16, 512  ;;  %p2008_p13 = scmp.lt.s32.totalorder %s2403_s0, %s2006_s16 }
  0xa4   : > { %p2003_p8 = pnand %p2001_p4, %p1957_p12  ;;  %p2009_p3 = scmp.lt.s32.totalorder %s2007_s13, %s2000_s2 }
  0xa6   : > { %p2004_p1 = pneg %p2003_p8  ;;  %p2010_p5 = por %p2009_p3, %p2008_p13 }
  0xa8   : > { %p2011_p11 = pnand %p2010_p5, %p2004_p1 }
  0xaa   : > { %2014 = shalt.err (!%p2011_p11)
}
  0xab   : > { %1779 = dma.hbm_to_vmem [thread:$0]  (!%p2358_p7), %s2399_s29, 256, %s2403_s0, %s2407_s6, %s3279_s20, %s3279_s20, %s3278_s12  }
  0xac   : > { %p3281_p12 = scmp.ne.s32.totalorder %s3268_s23, 0 }
  0xae   : > { %414 = sbr.rel (%p3281_p12) target bundleno = 1095 (0x447), region = 60 }
  0xb5   : > { %s2439_s8 = sand.u32 1, %s2093_s14   ;;  %p3282_p6 = scmp.ne.s32.totalorder %s3265_s21, 0 }
  0xb6   : > { %s1546_s11 = sshll.u32 %s2439_s8, 5  ;;  %s417_s22 = scalar_lea.sflag [#allocation4], %s2439_s8 }
  0xb7   : > { %s2445_s7 = scalar_lea.vmem [#allocation3], %s1546_s11 }
  0xb8   : > { %2068 = dma.done.wait (%p3282_p6), %s417_s22, 512  }
  0xb9   : > { %2070 = vsyncadd (%p3282_p6), %s417_s22, 4294966784  ;;  %s425_s0 = sand.u32 1, %s2207_s19   ;;  %s1547_s6 = sshll.u32 %s2439_s8, 4 }
  0xba   : > { %s426_s23 = scalar_lea.sflag [#allocation7], %s425_s0  ;;  %s2453_s12 = scalar_lea.vmem [#allocation6], %s1547_s6 }
  0xbb   : > { %2072 = dma.done.wait (%p3282_p6), %s426_s23, 256  }
  0xbc   : > { %2074 = vsyncadd (%p3282_p6), %s426_s23, 4294967040  ;;  %p3283_p7 = scmp.eq.s32.totalorder %s2207_s19, 0 }
  0xbe   : > { %2076 = dma.done.wait (%p3283_p7), [#allocation7], 256   ;;  %p3284_p9 = pmov %p3283_p7 }
  0xbf   : > { %p3285_p0 = pmov %p3283_p7 }
  0xc0   : > { %2078 = vsyncadd (%p3284_p9), [#allocation7], 4294967040 }
  0xc1   : > { %2080 = dma.done.wait (%p3285_p0), [#allocation10], 4096   ;;  %p3286_p2 = pmov %p3285_p0 }
  0xc2   : > { %v505_v0 = vlaneseq  ;;  %v2474_v6 = vld [vmem:[%s2453_s12] sm:$0xff]  ;;  %vm539_vm0 = vcmask 1046528   ;;  %vm602_vm1 = vcmask 1045504   ;;  %v2481_v9 = vld [vmem:[%s2445_s7 + $0x8] sm:$0xff]  ;;  %vm665_vm2 = vcmask 1044480   ;;  %s3370_s2 = sld [smem:[#allocation39_spill]] }
  0xc3   : > { %2082 = vsyncadd (%p3286_p2), [#allocation10], 4294963200  ;;  %v2477_v7 = vld [vmem:[%s2445_s7] sm:$0xff]  ;;  %v2485_v11 = vld [vmem:[#allocation8 + $0x8] sm:$0xff]  ;;  %vm728_vm3 = vcmask 1043456   ;;  %vm791_vm4 = vcmask 1042432  }
  0xc4   : > { %v2467_v1 = vshrl.u32 %v505_v0, 7  ;;  %v2483_v10 = vld [vmem:[#allocation8] sm:$0xff]  ;;  %vm854_vm5 = vcmask 1041408   ;;  %vm917_vm6 = vcmask 1040384   ;;  %s3371_s30 = sld [smem:[#allocation19_spill]]  ;;  %s3372_s22 = sld [smem:[#allocation41_spill]] }
  0xc5   : > { %s482_s0 = scalar_lea.vmem [#allocation12], %s1546_s11  ;;  %s3373_s19 = sld [smem:[#allocation42_spill]] }
  0xc6   : > { %v507_v2 = vsub.s32 7, %v2467_v1  ;;  %v527_v3 = vsub.s32 0, %v2467_v1  ;;  %v590_v4 = vsub.s32 1, %v2467_v1  ;;  %v653_v5 = vsub.s32 2, %v2467_v1  ;;  %s1391_s6 = sshll.u32 %s482_s0, 4  ;;  %s1376_s21 = scalar_lea.sflag [#allocation5], %s2439_s8  ;;  %s3134_s6 = int_to_ptr.vmem [resolvable:$true] %s1391_s6 }
  0xc7   : > { %v716_v8 = vsub.s32 3, %v2467_v1  ;;  %v779_v12 = vsub.s32 4, %v2467_v1  ;;  %v842_v13 = vsub.s32 5, %v2467_v1  ;;  %v905_v14 = vsub.s32 6, %v2467_v1  ;;  %s2015_s20 = scalar_lea.vmem %s3134_s6, 512  ;;  %s2118_s29 = smov [#allocation12]  }
  0xc8   : > { %v2491_v15 = vrot.slane %v2483_v10, %v507_v2  ;;  %v2494_v16 = vrot.slane %v2485_v11, %v507_v2  ;;  %v2497_v17 = vrot.slane %v2483_v10, %v527_v3  ;;  %v2500_v18 = vrot.slane %v2485_v11, %v527_v3  ;;  %p2016_p4 = scmp.ne.s32.totalorder %s3134_s6, %s2015_s20  ;;  %s2019_s28 = sshll.u32 %s2118_s29, 4  ;;  %s2020_s28 = int_to_ptr.vmem [resolvable:$false] %s2019_s28 }
  0xc9   : > { %v2503_v19 = vrot.slane %v2483_v10, %v590_v4  ;;  %v2506_v20 = vrot.slane %v2485_v11, %v590_v4  ;;  %v2509_v21 = vrot.slane %v2483_v10, %v653_v5  ;;  %v2512_v22 = vrot.slane %v2485_v11, %v653_v5  ;;  %s2021_s10 = scalar_lea.vmem %s2020_s28, 1024  ;;  %p2022_p13 = scmp.lt.s32.totalorder %s3134_s6, %s2020_s28 }
  0xca   : > { %v509_v23 = vmul.f32 %v2491_v15, %v2477_v7  ;;  %v517_v24 = vmul.f32 %v2494_v16, %v2481_v9  ;;  %v529_v25 = vmul.f32 %v2497_v17, %v2474_v6  ;;  %v2522_v26 = vmul.f32 %v2497_v17, %v2477_v7  ;;  %s1564_s23 = sshll.u32 %s3371_s30, 9  ;;  %p2017_p8 = pnand %p2016_p4, %p2332_p10 }
  0xcb   : > { %v561_v27 = vmul.f32 %v2500_v18, %v2477_v7  ;;  %v2528_v28 = vmul.f32 %v2500_v18, %v2481_v9  ;;  %v592_v29 = vmul.f32 %v2503_v19, %v2474_v6  ;;  %v2534_v30 = vmul.f32 %v2503_v19, %v2477_v7  ;;  %s3140_s11 = scalar_lea.hbm %s3373_s19, %s1564_s23  ;;  %p2023_p3 = scmp.lt.s32.totalorder %s2021_s10, %s2015_s20 }
  0xcc   : > { %v521_v31 = vadd.f32 %v517_v24, %v509_v23  ;;  %v540_v32 = vrot.slane %v529_v25, 1  ;;  %v3235_v33 = vrot.slane %v2522_v26, 1  ;;  %v624_v34 = vmul.f32 %v2506_v20, %v2477_v7  ;;  %p2018_p1 = pneg %p2017_p8 }
  0xcd   : > { %v571_v35 = vrot.slane %v561_v27, 1  ;;  %v3229_v36 = vrot.slane %v2528_v28, 1  ;;  %v603_v37 = vrot.slane %v592_v29, 2  ;;  %v3227_v38 = vrot.slane %v2534_v30, 2  ;;  %p2024_p5 = por %p2023_p3, %p2022_p13 }
  0xce   : > { %v542_v39 = vsel %vm539_vm0, %v540_v32, %v3235_v33  ;;  %v2546_v40 = vmul.f32 %v2506_v20, %v2481_v9  ;;  %v634_v41 = vrot.slane %v624_v34, 2  ;;  %v655_v42 = vmul.f32 %v2509_v21, %v2474_v6 }
  0xcf   : > { %v553_v43 = vadd.f32 %v542_v39, %v521_v31  ;;  %v573_v44 = vsel %vm539_vm0, %v571_v35, %v3229_v36  ;;  %v605_v45 = vsel %vm602_vm1, %v603_v37, %v3227_v38  ;;  %v2558_v46 = vmul.f32 %v2509_v21, %v2477_v7  ;;  %p2025_p11 = pnand %p2024_p5, %p2018_p1 }
  0xd0   : > { %v3224_v47 = vrot.slane %v2546_v40, 2  ;;  %v666_v48 = vrot.slane %v655_v42, 3  ;;  %v687_v49 = vmul.f32 %v2512_v22, %v2477_v7  ;;  %v2565_v50 = vmul.f32 %v2512_v22, %v2481_v9 }
  0xd1   : > { %v584_v51 = vadd.f32 %v573_v44, %v553_v43  ;;  %v3223_v52 = vrot.slane %v2558_v46, 3  ;;  %v2569_v53 = vrot.slane %v2483_v10, %v716_v8  ;;  %v2572_v54 = vrot.slane %v2485_v11, %v716_v8 }
  0xd2   : > { %v636_v55 = vsel %vm602_vm1, %v634_v41, %v3224_v47  ;;  %v697_v56 = vrot.slane %v687_v49, 3  ;;  %v3219_v57 = vrot.slane %v2565_v50, 3  ;;  %v2581_v58 = vrot.slane %v2483_v10, %v779_v12 }
  0xd3   : > { %v616_v59 = vadd.f32 %v605_v45, %v584_v51  ;;  %v668_v60 = vsel %vm665_vm2, %v666_v48, %v3223_v52  ;;  %v718_v61 = vmul.f32 %v2569_v53, %v2474_v6  ;;  %v2590_v62 = vmul.f32 %v2569_v53, %v2477_v7 }
  0xd4   : > { %v699_v63 = vsel %vm665_vm2, %v697_v56, %v3219_v57  ;;  %v750_v0 = vmul.f32 %v2572_v54, %v2477_v7  ;;  %v2599_v2 = vmul.f32 %v2572_v54, %v2481_v9  ;;  %v781_v3 = vmul.f32 %v2581_v58, %v2474_v6 }
  0xd5   : > { %v647_v4 = vadd.f32 %v636_v55, %v616_v59  ;;  %v729_v5 = vrot.slane %v718_v61, 4  ;;  %v3218_v8 = vrot.slane %v2590_v62, 4  ;;  %v2606_v23 = vmul.f32 %v2581_v58, %v2477_v7  ;;  %v2660_v61 = vld [vmem:[%s2445_s7 + $0x10] sm:$0xff] }
  0xd6   : > { %v760_v24 = vrot.slane %v750_v0, 4  ;;  %v3217_v25 = vrot.slane %v2599_v2, 4  ;;  %v792_v27 = vrot.slane %v781_v3, 5  ;;  %v2612_v29 = vrot.slane %v2485_v11, %v779_v12  ;;  %3292 = vst [vmem:[#allocation26_spill] sm:$0xff] %v2660_v61 }
  0xd7   : > { %v679_v31 = vadd.f32 %v668_v60, %v647_v4  ;;  %v731_v32 = vsel %vm728_vm3, %v729_v5, %v3218_v8  ;;  %v3216_v34 = vrot.slane %v2606_v23, 5  ;;  %v2621_v35 = vrot.slane %v2483_v10, %v842_v13  ;;  %v2672_v5 = vld [vmem:[%s2445_s7 + $0x18] sm:$0xff] }
  0xd8   : > { %v762_v37 = vsel %vm728_vm3, %v760_v24, %v3217_v25  ;;  %v813_v12 = vmul.f32 %v2612_v29, %v2477_v7  ;;  %v2630_v39 = vmul.f32 %v2612_v29, %v2481_v9  ;;  %v2635_v41 = vrot.slane %v2485_v11, %v842_v13 }
  0xd9   : > { %3287 = vst [vmem:[#allocation21_spill] sm:$0xff] %v2621_v35  ;;  %v710_v42 = vadd.f32 %v699_v63, %v679_v31  ;;  %v794_v43 = vsel %vm791_vm4, %v792_v27, %v3216_v34  ;;  %v844_v44 = vmul.f32 %v2621_v35, %v2474_v6  ;;  %v2644_v45 = vmul.f32 %v2621_v35, %v2477_v7 }
  0xda   : > { %3288 = vst [vmem:[#allocation22_spill] sm:$0xff] %v2635_v41  ;;  %v823_v48 = vrot.slane %v813_v12, 5  ;;  %v3215_v49 = vrot.slane %v2630_v39, 5  ;;  %v876_v13 = vmul.f32 %v2635_v41, %v2477_v7  ;;  %v2651_v51 = vmul.f32 %v2635_v41, %v2481_v9 }
  0xdb   : > { %3289 = vst [vmem:[#allocation23_spill] sm:$0xff] %v2644_v45  ;;  %v742_v55 = vadd.f32 %v731_v32, %v710_v42  ;;  %v855_v56 = vrot.slane %v844_v44, 6  ;;  %v3214_v59 = vrot.slane %v2644_v45, 6  ;;  %v2657_v60 = vrot.slane %v2483_v10, %v905_v14 }
  0xdc   : > { %3290 = vst [vmem:[#allocation24_spill] sm:$0xff] %v2651_v51  ;;  %v825_v63 = vsel %vm791_vm4, %v823_v48, %v3215_v49  ;;  %v886_v0 = vrot.slane %v876_v13, 6  ;;  %v3213_v3 = vrot.slane %v2651_v51, 6  ;;  %v2669_v4 = vrot.slane %v2485_v11, %v905_v14 }
  0xdd   : > { %3291 = vst [vmem:[#allocation25_spill] sm:$0xff] %v2657_v60  ;;  %v773_v24 = vadd.f32 %v762_v37, %v742_v55  ;;  %v857_v10 = vsel %vm854_vm5, %v855_v56, %v3214_v59  ;;  %v907_v27 = vmul.f32 %v2657_v60, %v2474_v6  ;;  %v2681_v31 = vmul.f32 %v2657_v60, %v2477_v7 }
  0xde   : > { %3293 = vst [vmem:[#allocation27_spill] sm:$0xff] %v2669_v4  ;;  %v888_v1 = vsel %vm854_vm5, %v886_v0, %v3213_v3  ;;  %v939_v11 = vmul.f32 %v2669_v4, %v2477_v7  ;;  %v2690_v14 = vmul.f32 %v2669_v4, %v2481_v9  ;;  %v511_v32 = vmul.f32 %v2491_v15, %v2660_v61 }
  0xdf   : > { %3294 = vst [vmem:[#allocation28_spill] sm:$0xff] %v2681_v31  ;;  %v805_v37 = vadd.f32 %v794_v43, %v773_v24  ;;  %v918_v6 = vrot.slane %v907_v27, 7  ;;  %v3212_v12 = vrot.slane %v2681_v31, 7  ;;  %v519_v42 = vmul.f32 %v2494_v16, %v2672_v5 }
  0xe0   : > { %3295 = vst [vmem:[#allocation29_spill] sm:$0xff] %v2690_v14  ;;  %v949_v44 = vrot.slane %v939_v11, 7  ;;  %v3211_v48 = vrot.slane %v2690_v14, 7  ;;  %v2700_v7 = vmul.f32 %v2497_v17, %v2481_v9  ;;  %v2704_v13 = vmul.f32 %v2497_v17, %v2660_v61 }
  0xe1   : > { %v836_v55 = vadd.f32 %v825_v63, %v805_v37  ;;  %v920_v43 = vsel %vm917_vm6, %v918_v6, %v3212_v12  ;;  %v523_v56 = vadd.f32 %v519_v42, %v511_v32  ;;  %v2711_v0 = vmul.f32 %v2500_v18, %v2660_v61 }
  0xe2   : > { %v951_v24 = vsel %vm917_vm6, %v949_v44, %v3211_v48  ;;  %v3236_v27 = vrot.slane %v2700_v7, 1  ;;  %v3222_v11 = vrot.slane %v2704_v13, 1  ;;  %v2720_v63 = vmul.f32 %v2500_v18, %v2672_v5 }
  0xe3   : > { %v868_v37 = vadd.f32 %v857_v10, %v836_v55  ;;  %v3230_v6 = vrot.slane %v2711_v0, 1  ;;  %v2725_v32 = vmul.f32 %v2503_v19, %v2481_v9  ;;  %v2729_v42 = vmul.f32 %v2503_v19, %v2660_v61 }
  0xe4   : > { %v546_v44 = vsel %vm539_vm0, %v3236_v27, %v3222_v11  ;;  %v3220_v48 = vrot.slane %v2720_v63, 1  ;;  %v2739_v10 = vmul.f32 %v2506_v20, %v2660_v61  ;;  %v2743_v55 = vmul.f32 %v2506_v20, %v2672_v5 }
  0xe5   : > { %v899_v12 = vadd.f32 %v888_v1, %v868_v37  ;;  %v555_v3 = vadd.f32 %v546_v44, %v523_v56  ;;  %v3228_v59 = vrot.slane %v2725_v32, 2  ;;  %v3221_v49 = vrot.slane %v2729_v42, 2 }
  0xe6   : > { %v577_v34 = vsel %vm539_vm0, %v3230_v6, %v3220_v48  ;;  %v3226_v25 = vrot.slane %v2739_v10, 2  ;;  %v3225_v8 = vrot.slane %v2743_v55, 2  ;;  %v2756_v57 = vmul.f32 %v2509_v21, %v2481_v9  ;;  %v2770_v48 = vld [vmem:[%s3193_s3] ss:$0 sm:$0xff] }
  0xe7   : > { %v931_v1 = vadd.f32 %v920_v43, %v899_v12  ;;  %v586_v56 = vadd.f32 %v577_v34, %v555_v3  ;;  %v609_v37 = vsel %vm602_vm1, %v3228_v59, %v3221_v49  ;;  %v2765_v44 = vmul.f32 %v2509_v21, %v2660_v61 }
  0xe8   : > { %v640_v34 = vsel %vm602_vm1, %v3226_v25, %v3225_v8  ;;  %v3232_v3 = vrot.slane %v2756_v57, 3  ;;  %v2780_v12 = vmul.f32 %v2512_v22, %v2660_v61  ;;  %v2784_v43 = vmul.f32 %v2512_v22, %v2672_v5 }
  0xe9   : > { %v962_v49 = vadd.f32 %v951_v24, %v931_v1  ;;  %v618_v11 = vadd.f32 %v609_v37, %v586_v56  ;;  %v3231_v52 = vrot.slane %v2765_v44, 3  ;;  %v2789_v47 = vmul.f32 %v2569_v53, %v2481_v9 }
  0xea   : > { %v3234_v8 = vrot.slane %v2780_v12, 3  ;;  %v3233_v25 = vrot.slane %v2784_v43, 3  ;;  %v2795_v38 = vmul.f32 %v2569_v53, %v2660_v61  ;;  %v2799_v59 = vmul.f32 %v2572_v54, %v2660_v61 }
  0xeb   : > { %v2802_v24 = vadd.f32 %v2770_v48, %v962_v49  ;;  %v649_v1 = vadd.f32 %v640_v34, %v618_v11  ;;  %v672_v56 = vsel %vm665_vm2, %v3232_v3, %v3231_v52  ;;  %v3240_v37 = vrot.slane %v2789_v47, 4 }
  0xec   : > { %v703_v36 = vsel %vm665_vm2, %v3234_v8, %v3233_v25  ;;  %v3239_v6 = vrot.slane %v2795_v38, 4  ;;  %v2818_v49 = vmul.f32 %v2572_v54, %v2672_v5  ;;  %v2824_v52 = vmul.f32 %v2581_v58, %v2481_v9 }
  0xed   : > { %3296 = vst [vmem:[#allocation30_spill] sm:$0xff] %v2802_v24  ;;  %977 = vadd.xlane.f32.xlu0 %v2802_v24  ;;  %v681_v34 = vadd.f32 %v672_v56, %v649_v1  ;;  %v2828_v3 = vmul.f32 %v2581_v58, %v2660_v61  ;;  %v2832_v25 = vmul.f32 %v2612_v29, %v2660_v61  ;;  %v3301_v14 = vrot.slane %v2799_v59, 4 }
  0xee   : > { %3297 = vst [vmem:[#allocation31_spill] sm:$0xff] %v2818_v49  ;;  %v735_v8 = vsel %vm728_vm3, %v3240_v37, %v3239_v6  ;;  %v3244_v1 = vrot.slane %v2818_v49, 4  ;;  %v2842_v56 = vmul.f32 %v2612_v29, %v2672_v5  ;;  %v2846_v33 = vmul.f32 %v2621_v35, %v2481_v9 }
  0xef   : > { %3298 = vst [vmem:[#allocation32_spill] sm:$0xff] %v2828_v3  ;;  %v712_v27 = vadd.f32 %v703_v36, %v681_v34  ;;  %v3247_v24 = vrot.slane %v2828_v3, 5  ;;  %v2859_v51 = vmul.f32 %v2621_v35, %v2660_v61  ;;  %v2864_v34 = vmul.f32 %v2635_v41, %v2660_v61 }
  0xf0   : > { %3299 = vst [vmem:[#allocation33_spill] sm:$0xff] %v2842_v56  ;;  %3300 = vst [vmem:[#allocation34_spill] sm:$0xff] %v2846_v33  ;;  %v766_v6 = vsel %vm728_vm3, %v3301_v14, %v3244_v1  ;;  %v2868_v11 = vmul.f32 %v2635_v41, %v2672_v5  ;;  %v3303_v14 = vrot.slane %v2824_v52, 5  ;;  %v2886_v31 = vmul.f32 %v2669_v4, %v2660_v61 }
  0xf1   : > { %3302 = vst [vmem:[#allocation35_spill] sm:$0xff] %v2859_v51  ;;  %v744_v45 = vadd.f32 %v735_v8, %v712_v27  ;;  %v2878_v8 = vmul.f32 %v2657_v60, %v2481_v9  ;;  %v2882_v27 = vmul.f32 %v2657_v60, %v2660_v61  ;;  %v3304_v3 = vrot.slane %v2842_v56, 5 }
  0xf2   : > { %v798_v1 = vsel %vm791_vm4, %v3303_v14, %v3247_v24  ;;  %v3305_v41 = vrot.slane %v2832_v25, 5  ;;  %v2897_v60 = vmul.f32 %v2669_v4, %v2672_v5  ;;  %v3306_v49 = vrot.slane %v2859_v51, 6 }
  0xf3   : > { %v775_v36 = vadd.f32 %v766_v6, %v744_v45  ;;  %v510_v6 = vmul.f32 %v2491_v15, %v2481_v9  ;;  %v3307_v56 = vrot.slane %v2846_v33, 6  ;;  %v518_v24 = vmul.f32 %v2494_v16, %v2660_v61 }
  0xf4   : > { %v829_v14 = vsel %vm791_vm4, %v3305_v41, %v3304_v3  ;;  %v3308_v9 = vrot.slane %v2700_v7, 1  ;;  %v3315_v7 = vrot.slane %v2878_v8, 7  ;;  %v3316_v61 = vrot.slane %v2725_v32, 2 }
  0xf5   : > { %v807_v45 = vadd.f32 %v798_v1, %v775_v36  ;;  %v861_v35 = vsel %vm854_vm5, %v3307_v56, %v3306_v49  ;;  %v3309_v36 = vrot.slane %v2522_v26, 1  ;;  %v3310_v49 = vrot.slane %v2868_v11, 6  ;;  %v2928_v1 = vld [vmem:[%s2453_s12 + $0x8] sm:$0xff] }
  0xf6   : > { %v3311_v56 = vrot.slane %v2864_v34, 6  ;;  %v522_v3 = vadd.f32 %v518_v24, %v510_v6  ;;  %v3314_v26 = vrot.slane %v2882_v27, 7  ;;  %v3317_v24 = vrot.slane %v2534_v30, 2 }
  0xf7   : > { %v838_v37 = vadd.f32 %v829_v14, %v807_v45  ;;  %v544_v51 = vsel %vm539_vm0, %v3309_v36, %v3308_v9  ;;  %v3312_v14 = vrot.slane %v2711_v0, 1  ;;  %v3313_v45 = vrot.slane %v2528_v28, 1 }
  0xf8   : > { %v892_v41 = vsel %vm854_vm5, %v3311_v56, %v3310_v49  ;;  %v924_v9 = vsel %vm917_vm6, %v3315_v7, %v3314_v26  ;;  %v554_v36 = vadd.f32 %v544_v51, %v522_v3  ;;  %v3318_v28 = vrot.slane %v2897_v60, 7 }
  0xf9   : > { %v870_v33 = vadd.f32 %v861_v35, %v838_v37  ;;  %v575_v4 = vsel %vm539_vm0, %v3313_v45, %v3312_v14  ;;  %v607_v35 = vsel %vm602_vm1, %v3317_v24, %v3316_v61  ;;  %v3319_v37 = vrot.slane %v2886_v31, 7 }
  0xfa   : > { %v3320_v49 = vrot.slane %v2739_v10, 2  ;;  %v3321_v56 = vrot.slane %v2546_v40, 2  ;;  %v512_v51 = vmul.f32 %v2491_v15, %v2672_v5  ;;  %v585_v32 = vadd.f32 %v575_v4, %v554_v36 }
  0xfb   : > { %v901_v0 = vadd.f32 %v892_v41, %v870_v33  ;;  %v955_v6 = vsel %vm917_vm6, %v3319_v37, %v3318_v28  ;;  %v520_v30 = vmul.f32 %v2494_v16, %v2928_v1  ;;  %v533_v33 = vmul.f32 %v2497_v17, %v2672_v5 }
  0xfc   : > { %v638_v14 = vsel %vm602_vm1, %v3321_v56, %v3320_v49  ;;  %v565_v61 = vmul.f32 %v2500_v18, %v2928_v1  ;;  %v596_v10 = vmul.f32 %v2503_v19, %v2672_v5  ;;  %v628_v40 = vmul.f32 %v2506_v20, %v2928_v1 }
  0xfd   : > { %v933_v41 = vadd.f32 %v924_v9, %v901_v0  ;;  %v659_v15 = vmul.f32 %v2509_v21, %v2672_v5  ;;  %v617_v4 = vadd.f32 %v607_v35, %v585_v32  ;;  %v524_v3 = vadd.f32 %v520_v30, %v512_v51 }
  0xfe   : > { %v547_v45 = vrot.slane %v533_v33, 1  ;;  %v578_v16 = vrot.slane %v565_v61, 1  ;;  %v3322_v17 = vrot.slane %v2756_v57, 3  ;;  %v3323_v7 = vrot.slane %v2558_v46, 3 }
  0xff   : > { %v964_v26 = vadd.f32 %v955_v6, %v933_v41  ;;  %v610_v9 = vrot.slane %v596_v10, 2  ;;  %v641_v36 = vrot.slane %v628_v40, 2  ;;  %v648_v19 = vadd.f32 %v638_v14, %v617_v4 }
 0x100   : > { %v670_v18 = vsel %vm665_vm2, %v3323_v7, %v3322_v17  ;;  %v3324_v24 = vrot.slane %v2704_v13, 1  ;;  %v3325_v21 = vrot.slane %v2720_v63, 1  ;;  %v691_v0 = vmul.f32 %v2512_v22, %v2928_v1 }
 0x101   : > { %v2978_v57 = vadd.f32 %v2770_v48, %v964_v26  ;;  %v3326_v46 = vrot.slane %v2780_v12, 3  ;;  %v3327_v28 = vrot.slane %v2565_v50, 3  ;;  %v680_v13 = vadd.f32 %v670_v18, %v648_v19 }
 0x102   : > { %v548_v20 = vsel %vm539_vm0, %v3324_v24, %v547_v45  ;;  %v579_v35 = vsel %vm539_vm0, %v3325_v21, %v578_v16  ;;  %v3328_v49 = vrot.slane %v2729_v42, 2  ;;  %v673_v56 = vrot.slane %v659_v15, 3 }
 0x103   : > { %v701_v37 = vsel %vm665_vm2, %v3327_v28, %v3326_v46  ;;  %v556_v6 = vadd.f32 %v548_v20, %v524_v3  ;;  %v722_v14 = vmul.f32 %v2569_v53, %v2672_v5  ;;  %981 = vadd.xlane.f32.xlu1 %v2978_v57  ;;  %v3329_v22 = vrot.slane %v2789_v47, 4  ;;  %v3342_v20 = vld [vmem:[#allocation34_spill] sm:$0xff]  ;;  %v3346_v46 = vld [vmem:[#allocation31_spill] sm:$0xff] }
 0x104   : > { %v611_v63 = vsel %vm602_vm1, %v3328_v49, %v610_v9  ;;  %v3330_v12 = vrot.slane %v2590_v62, 4  ;;  %v711_v32 = vadd.f32 %v701_v37, %v680_v13  ;;  %v3331_v30 = vrot.slane %v2743_v55, 2 }
 0x105   : > { %v587_v51 = vadd.f32 %v579_v35, %v556_v6  ;;  %v704_v33 = vrot.slane %v691_v0, 3  ;;  %v754_v61 = vmul.f32 %v2572_v54, %v2928_v1  ;;  %v3332_v53 = vrot.slane %v2799_v59, 4  ;;  %v3344_v35 = vld [vmem:[#allocation23_spill] sm:$0xff] }
 0x106   : > { %v733_v50 = vsel %vm728_vm3, %v3330_v12, %v3329_v22  ;;  %v642_v42 = vsel %vm602_vm1, %v3331_v30, %v641_v36  ;;  %v3333_v41 = vrot.slane %v2599_v2, 4  ;;  %v3334_v40 = vrot.slane %v2765_v44, 3 }
 0x107   : > { %v619_v10 = vadd.f32 %v611_v63, %v587_v51  ;;  %v743_v62 = vadd.f32 %v733_v50, %v711_v32  ;;  %v736_v4 = vrot.slane %v722_v14, 4  ;;  %v785_v55 = vmul.f32 %v2581_v58, %v2672_v5  ;;  %v3350_v63 = vld [vmem:[#allocation24_spill] sm:$0xff] }
 0x108   : > { %v764_v47 = vsel %vm728_vm3, %v3333_v41, %v3332_v53  ;;  %v674_v15 = vsel %vm665_vm2, %v3334_v40, %v673_v56  ;;  %v3335_v3 = vrot.slane %v2824_v52, 5  ;;  %v3336_v54 = vrot.slane %v2606_v23, 5  ;;  %v3352_v50 = vld [vmem:[#allocation32_spill] sm:$0xff] }
 0x109   : > { %v650_v45 = vadd.f32 %v642_v42, %v619_v10  ;;  %v774_v2 = vadd.f32 %v764_v47, %v743_v62  ;;  %v3337_v16 = vrot.slane %v2784_v43, 3  ;;  %v767_v17 = vrot.slane %v754_v61, 4  ;;  %v3341_v43 = vld [vmem:[#allocation21_spill] sm:$0xff]  ;;  %v3356_v53 = vld [vmem:[#allocation28_spill] sm:$0xff] }
 0x10a   : > { %v796_v59 = vsel %vm791_vm4, %v3336_v54, %v3335_v3  ;;  %v817_v44 = vmul.f32 %v2612_v29, %v2928_v1  ;;  %v3338_v7 = vrot.slane %v2832_v25, 5  ;;  %v3339_v58 = vrot.slane %v2630_v39, 5  ;;  %v3354_v42 = vld [vmem:[#allocation25_spill] sm:$0xff] }
 0x10b   : > { %v705_v26 = vsel %vm665_vm2, %v3337_v16, %v704_v33  ;;  %v682_v18 = vadd.f32 %v674_v15, %v650_v45  ;;  %v806_v23 = vadd.f32 %v796_v59, %v774_v2  ;;  %v3340_v9 = vrot.slane %v2795_v38, 4  ;;  %v3348_v38 = vld [vmem:[#allocation22_spill] sm:$0xff]  ;;  %v3358_v62 = vld [vmem:[#allocation33_spill] sm:$0xff] }
 0x10c   : > { %v827_v52 = vsel %vm791_vm4, %v3339_v58, %v3338_v7  ;;  %v799_v19 = vrot.slane %v785_v55, 5  ;;  %v848_v24 = vmul.f32 %v3341_v43, %v2672_v5  ;;  %v3343_v21 = vrot.slane %v3342_v20, 6  ;;  %v3360_v55 = vld [vmem:[#allocation27_spill] sm:$0xff]  ;;  %v3362_v59 = vld [vmem:[#allocation29_spill] sm:$0xff] }
 0x10d   : > { %v737_v36 = vsel %vm728_vm3, %v3340_v9, %v736_v4  ;;  %v3345_v29 = vrot.slane %v3344_v35, 6  ;;  %v713_v0 = vadd.f32 %v705_v26, %v682_v18  ;;  %v837_v39 = vadd.f32 %v827_v52, %v806_v23  ;;  %v3364_v26 = vld [vmem:[#allocation35_spill] sm:$0xff] }
 0x10e   : > { %v3347_v28 = vrot.slane %v3346_v46, 4  ;;  %v830_v6 = vrot.slane %v817_v44, 5  ;;  %v880_v13 = vmul.f32 %v3348_v38, %v2928_v1  ;;  %v3349_v49 = vrot.slane %v2864_v34, 6  ;;  %v1058_v46 = vld [vmem:[#allocation9 + $0x18] sm:$0xff] }
 0x10f   : > { %v859_v25 = vsel %vm854_vm5, %v3345_v29, %v3343_v21  ;;  %v3351_v56 = vrot.slane %v3350_v63, 6  ;;  %v745_v22 = vadd.f32 %v737_v36, %v713_v0  ;;  %v3353_v51 = vrot.slane %v3352_v50, 5  ;;  %v1055_v29 = vld [vmem:[#allocation9] sm:$0xff]  ;;  %v1057_v0 = vld [vmem:[#allocation9 + $0x10] sm:$0xff] }
 0x110   : > { %v768_v37 = vsel %vm728_vm3, %v3347_v28, %v767_v17  ;;  %v869_v12 = vadd.f32 %v859_v25, %v837_v39  ;;  %v862_v30 = vrot.slane %v848_v24, 6  ;;  %v911_v33 = vmul.f32 %v3354_v42, %v2672_v5  ;;  %v1056_v25 = vld [vmem:[#allocation9 + $0x8] sm:$0xff] }
 0x111   : > { %v890_v14 = vsel %vm854_vm5, %v3351_v56, %v3349_v49  ;;  %v800_v32 = vsel %vm791_vm4, %v3353_v51, %v799_v19  ;;  %v3355_v61 = vrot.slane %v2878_v8, 7  ;;  %v3357_v41 = vrot.slane %v3356_v53, 7  ;;  %v1059_v56 = vld [vmem:[#allocation9 + $0x20] sm:$0xff]  ;;  %v1062_v53 = vld [vmem:[#allocation9 + $0x38] sm:$0xff] }
 0x112   : > { %v776_v47 = vadd.f32 %v768_v37, %v745_v22  ;;  %v900_v10 = vadd.f32 %v890_v14, %v869_v12  ;;  %v3359_v40 = vrot.slane %v3358_v62, 5  ;;  %v893_v4 = vrot.slane %v880_v13, 6  ;;  %v1060_v14 = vld [vmem:[#allocation9 + $0x28] sm:$0xff]  ;;  %v1065_v62 = vld [vmem:[#allocation9 + $0x50] sm:$0xff] }
 0x113   : > { %v922_v34 = vsel %vm917_vm6, %v3357_v41, %v3355_v61  ;;  %v943_v3 = vmul.f32 %v3360_v55, %v2928_v1  ;;  %v3361_v54 = vrot.slane %v2886_v31, 7  ;;  %v3363_v45 = vrot.slane %v3362_v59, 7  ;;  %v1061_v61 = vld [vmem:[#allocation9 + $0x30] sm:$0xff]  ;;  %v1068_v55 = vld [vmem:[#allocation9 + $0x68] sm:$0xff]  ;;  %v1070_v59 = vld [vmem:[#allocation9 + $0x78] sm:$0xff] }
 0x114   : > { %v831_v15 = vsel %vm791_vm4, %v3359_v40, %v830_v6  ;;  %v808_v2 = vadd.f32 %v800_v32, %v776_v47  ;;  %v932_v16 = vadd.f32 %v922_v34, %v900_v10  ;;  %v3365_v17 = vrot.slane %v3364_v26, 6  ;;  %v1063_v34 = vld [vmem:[#allocation9 + $0x40] sm:$0xff]  ;;  %v1064_v47 = vld [vmem:[#allocation9 + $0x48] sm:$0xff]  ;;  %v1066_v40 = vld [vmem:[#allocation9 + $0x58] sm:$0xff] }
 0x115   : > { %v953_v8 = vsel %vm917_vm6, %v3363_v45, %v3361_v54  ;;  %v925_v7 = vrot.slane %v911_v33, 7  ;;  %v3366_v18 = vrot.slane %v2868_v11, 6  ;;  %v956_v1 = vrot.slane %v943_v3, 7  ;;  %v1069_v3 = vld [vmem:[#allocation9 + $0x70] sm:$0xff] }
 0x116   : > { %v863_v44 = vsel %vm854_vm5, %v3365_v17, %v862_v30  ;;  %v839_v58 = vadd.f32 %v831_v15, %v808_v2  ;;  %v963_v52 = vadd.f32 %v953_v8, %v932_v16  ;;  %v3367_v36 = vrot.slane %v2882_v27, 7 }
 0x117   : > { %v894_v23 = vsel %vm854_vm5, %v3366_v18, %v893_v4  ;;  %v3368_v24 = vrot.slane %v2897_v60, 7  ;;  %v1681_v39 = vpack.c.bf16 %v1056_v25, %v1055_v29  ;;  %v1685_v28 = vpack.c.bf16 %v1058_v46, %v1057_v0  ;;  %v3369_v60 = vld [vmem:[#allocation30_spill] sm:$0xff]  ;;  %v1067_v4 = vld [vmem:[#allocation9 + $0x60] sm:$0xff]  ;;  %v1554_v18 = vld [vmem:[%s3195_s5] ss:$0 sm:$0xff] }
 0x118   : > { %v871_v9 = vadd.f32 %v863_v44, %v839_v58  ;;  %v974_v31 = vadd.f32 %v2770_v48, %v963_v52  ;;  %v926_v19 = vsel %vm917_vm6, %v3367_v36, %v925_v7  ;;  %v1689_v22 = vpack.c.bf16 %v1060_v14, %v1059_v56  ;;  %v1553_v58 = vld [vmem:[%s3194_s4] ss:$0 sm:$0xff] }
 0x119   : > { %v957_v20 = vsel %vm917_vm6, %v3368_v24, %v956_v1  ;;  %1682 = vmatprep.subr.bf16.mxu0 %v1681_v39  ;;  %v1693_v41 = vpack.c.bf16 %v1062_v53, %v1061_v61  ;;  %v1697_v10 = vpack.c.bf16 %v1064_v47, %v1063_v34  ;;  %v1701_v15 = vpack.c.bf16 %v1066_v40, %v1065_v62  ;;  %v1258_v61 = vld [vmem:[#allocation11 + $0x18] sm:$0xff]  ;;  %v1259_v53 = vld [vmem:[#allocation11 + $0x20] sm:$0xff]  ;;  %v1261_v47 = vld [vmem:[#allocation11 + $0x30] sm:$0xff] }
 0x11a   : > { %v902_v43 = vadd.f32 %v894_v23, %v871_v9  ;;  %979 = vadd.xlane.f32.xlu0 %v974_v31  ;;  %1684 = vmatpush3.bf16.msra.mxu0 %v1681_v39  ;;  %v1705_v54 = vpack.c.bf16 %v1068_v55, %v1067_v4  ;;  %v1709_v45 = vpack.c.bf16 %v1070_v59, %v1069_v3  ;;  %v1263_v62 = vld [vmem:[#allocation11 + $0x40] sm:$0xff]  ;;  %v1264_v40 = vld [vmem:[#allocation11 + $0x48] sm:$0xff]  ;;  %v1265_v4 = vld [vmem:[#allocation11 + $0x50] sm:$0xff] }
 0x11b   : > { %1686 = vmatprep.subr.bf16.mxu0 %v1685_v28  ;;  %v1266_v55 = vld [vmem:[#allocation11 + $0x58] sm:$0xff]  ;;  %v1268_v59 = vld [vmem:[#allocation11 + $0x68] sm:$0xff] }
 0x11c   : > { %v934_v21 = vadd.f32 %v926_v19, %v902_v43  ;;  %v1733_v3 = vpack.c.bf16 %v1266_v55, %v1265_v4 }
 0x11e   : > { %v965_v35 = vadd.f32 %v957_v20, %v934_v21  ;;  %1688 = vmatpush3.bf16.msra.mxu0 %v1685_v28 }
 0x11f   : > { %1690 = vmatprep.subr.bf16.mxu0 %v1689_v22 }
 0x120   : > { %v976_v11 = vadd.f32 %v2770_v48, %v965_v35 }
 0x122   : > { %983 = vadd.xlane.f32.xlu1 %v976_v11  ;;  %1692 = vmatpush3.bf16.msra.mxu0 %v1689_v22 }
 0x123   : > { %1694 = vmatprep.subr.bf16.mxu0 %v1693_v41 }
 0x126   : > { %1696 = vmatpush3.bf16.msra.mxu0 %v1693_v41  ;;  %v1260_v41 = vld [vmem:[#allocation11 + $0x28] sm:$0xff] }
 0x127   : > { %1698 = vmatprep.subr.bf16.mxu0 %v1697_v10  ;;  %v1721_v34 = vpack.c.bf16 %v1260_v41, %v1259_v53 }
 0x12a   : > { %1700 = vmatpush3.bf16.msra.mxu0 %v1697_v10  ;;  %v1262_v10 = vld [vmem:[#allocation11 + $0x38] sm:$0xff] }
 0x12b   : > { %1702 = vmatprep.subr.bf16.mxu0 %v1701_v15 }
 0x12e   : > { %1704 = vmatpush3.bf16.msra.mxu0 %v1701_v15  ;;  %v1729_v15 = vpack.c.bf16 %v1264_v40, %v1263_v62 }
 0x12f   : > { %1706 = vmatprep.subr.bf16.mxu0 %v1705_v54 }
 0x132   : > { %1708 = vmatpush3.bf16.msra.mxu0 %v1705_v54  ;;  %v1267_v54 = vld [vmem:[#allocation11 + $0x60] sm:$0xff] }
 0x133   : > { %1710 = vmatprep.subr.bf16.mxu0 %v1709_v45 }
 0x136   : > { %1712 = vmatpush3.bf16.msra.mxu0 %v1709_v45  ;;  %v1737_v45 = vpack.c.bf16 %v1268_v59, %v1267_v54 }
 0x17a   : > { %v978_v27 = vpop.xlane.xlu0 %977 }
 0x17b   : > { %v985_v37 = vmul.f32 0.125, %v978_v27 }
 0x17d   : > { %v989_v6 = vsub.f32 %v3369_v60, %v985_v37  ;;  %v1005_v8 = vmul.f32 %v985_v37, %v985_v37 }
 0x17f   : > { %v993_v38 = vmul.f32 %v989_v6, %v989_v6  ;;  %v1009_v2 = vmul.f32 120.0, %v1005_v8  ;;  %v1269_v8 = vld [vmem:[#allocation11 + $0x70] sm:$0xff] }
 0x181   : > { %997 = vadd.xlane.f32.xlu0 %v993_v38 }
 0x190   : > { %v982_v13 = vpop.xlane.xlu1 %981 }
 0x191   : > { %v987_v49 = vmul.f32 0.125, %v982_v13 }
 0x193   : > { %v3082_v48 = vsub.f32 %v2978_v57, %v987_v49  ;;  %v1007_v9 = vmul.f32 %v987_v49, %v987_v49 }
 0x195   : > { %v995_v63 = vmul.f32 %v3082_v48, %v3082_v48  ;;  %v1011_v36 = vmul.f32 120.0, %v1007_v9 }
 0x197   : > { %1001 = vadd.xlane.f32.xlu0 %v995_v63 }
 0x1a7   : > { %v980_v12 = vpop.xlane.xlu0 %979 }
 0x1a8   : > { %v986_v50 = vmul.f32 0.125, %v980_v12 }
 0x1aa   : > { %v3086_v51 = vsub.f32 %v974_v31, %v986_v50  ;;  %v1006_v24 = vmul.f32 %v986_v50, %v986_v50 }
 0x1ac   : > { %v994_v32 = vmul.f32 %v3086_v51, %v3086_v51  ;;  %v1010_v21 = vmul.f32 120.0, %v1006_v24 }
 0x1ae   : > { %999 = vadd.xlane.f32.xlu1 %v994_v32 }
 0x1af   : > { %v984_v30 = vpop.xlane.xlu1 %983 }
 0x1b0   : > { %v988_v57 = vmul.f32 0.125, %v984_v30  ;;  %v1255_v30 = vld [vmem:[#allocation11] sm:$0xff] }
 0x1b2   : > { %v3090_v42 = vsub.f32 %v976_v11, %v988_v57  ;;  %v1008_v29 = vmul.f32 %v988_v57, %v988_v57  ;;  %v1256_v57 = vld [vmem:[#allocation11 + $0x8] sm:$0xff] }
 0x1b4   : > { %v996_v33 = vmul.f32 %v3090_v42, %v3090_v42  ;;  %v1012_v39 = vmul.f32 120.0, %v1008_v29 }
 0x1b6   : > { %1003 = vadd.xlane.f32.xlu1 %v996_v33  ;;  %v1713_v33 = vpack.c.bf16 %v1256_v57, %v1255_v30 }
 0x1b8   : > { %1714 = vmatprep.subr.bf16.mxu1 %v1713_v33 }
 0x1b9   : > { %1716 = vmatpush3.bf16.msra.mxu1 %v1713_v33 }
 0x20e   : > { %v998_v16 = vpop.xlane.xlu0 %997 }
 0x20f   : > { %v1013_v26 = vsub.f32 %v998_v16, %v1009_v2  ;;  %v1270_v2 = vld [vmem:[#allocation11 + $0x78] sm:$0xff] }
 0x210   : > { %v1741_v16 = vpack.c.bf16 %v1270_v2, %v1269_v8 }
 0x211   : > { %v1017_v17 = vmul.f32 0.125, %v1013_v26  ;;  %v1555_v26 = vld [vmem:[%s3370_s2] ss:$0 sm:$0xff] }
 0x213   : > { %v1021_v44 = vadd.f32 1e-06, %v1017_v17 }
 0x215   : > { %1847 = vrsqrt.f32 %v1021_v44 }
 0x21f   : > { %v1848_v7 = vpop.eup %1847 }
 0x220   : > { %v1029_v52 = vmul.f32 %v1848_v7, %v989_v6 }
 0x222   : > { %v1040_v23 = vmul.f32 %v1553_v58, %v1029_v52 }
 0x224   : > { %v1051_v1 = vadd.f32 %v1554_v18, %v1040_v23  ;;  %v1002_v31 = vpop.xlane.xlu0 %1001 }
 0x225   : > { %v1015_v19 = vsub.f32 %v1002_v31, %v1011_v36 }
 0x226   : > { %1637 = vmatprep.mubr.f32.mxu0 %v1051_v1 }
 0x227   : > { %v1019_v43 = vmul.f32 0.125, %v1015_v19 }
 0x229   : > { %v1023_v20 = vadd.f32 1e-06, %v1019_v43 }
 0x22b   : > { %1849 = vrsqrt.f32 %v1023_v20 }
 0x235   : > { %v1850_v27 = vpop.eup %1849 }
 0x236   : > { %v1031_v6 = vmul.f32 %v1850_v27, %v3082_v48  ;;  %v1257_v48 = vld [vmem:[#allocation11 + $0x10] sm:$0xff] }
 0x238   : > { %v1042_v13 = vmul.f32 %v1553_v58, %v1031_v6 }
 0x23a   : > { %v1053_v56 = vadd.f32 %v1554_v18, %v1042_v13 }
 0x23b   : > { %v1000_v35 = vpop.xlane.xlu1 %999 }
 0x23c   : > { %v1014_v11 = vsub.f32 %v1000_v35, %v1010_v21 }
 0x23e   : > { %v1018_v25 = vmul.f32 0.125, %v1014_v11 }
 0x240   : > { %v1022_v0 = vadd.f32 1e-06, %v1018_v25 }
 0x242   : > { %1851 = vrsqrt.f32 %v1022_v0 }
 0x243   : > { %v1004_v46 = vpop.xlane.xlu1 %1003 }
 0x244   : > { %v1016_v28 = vsub.f32 %v1004_v46, %v1012_v39 }
 0x246   : > { %v1020_v37 = vmul.f32 0.125, %v1016_v28 }
 0x248   : > { %v1024_v60 = vadd.f32 1e-06, %v1020_v37 }
 0x24a   : > { %1853 = vrsqrt.f32 %v1024_v60 }
 0x24c   : > { %v1852_v38 = vpop.eup %1851 }
 0x24d   : > { %v1030_v49 = vmul.f32 %v1852_v38, %v3086_v51  ;;  %v1717_v51 = vpack.c.bf16 %v1258_v61, %v1257_v48 }
 0x24f   : > { %v1041_v63 = vmul.f32 %v1553_v58, %v1030_v49  ;;  %1718 = vmatprep.subr.bf16.mxu1 %v1717_v51 }
 0x250   : > { %1720 = vmatpush3.bf16.msra.mxu1 %v1717_v51 }
 0x251   : > { %v1052_v14 = vadd.f32 %v1554_v18, %v1041_v63  ;;  %1722 = vmatprep.subr.bf16.mxu1 %v1721_v34 }
 0x253   : > { %1638 = vmatmul.mubr.f32.vlgmr.msra.gmra.mrb[0].mxu0 %v1052_v14 }
 0x254   : > { %v1854_v22 = vpop.eup %1853  ;;  %1640 = vmatprep.mubr.f32.mxu0 %v1053_v56  ;;  %1724 = vmatpush3.bf16.msra.mxu1 %v1721_v34 }
 0x255   : > { %v1032_v12 = vmul.f32 %v1854_v22, %v3090_v42  ;;  %v1725_v42 = vpack.c.bf16 %v1262_v10, %v1261_v47 }
 0x257   : > { %v1043_v50 = vmul.f32 %v1553_v58, %v1032_v12  ;;  %1726 = vmatprep.subr.bf16.mxu1 %v1725_v42 }
 0x258   : > { %1728 = vmatpush3.bf16.msra.mxu1 %v1725_v42 }
 0x259   : > { %v1054_v32 = vadd.f32 %v1554_v18, %v1043_v50  ;;  %1730 = vmatprep.subr.bf16.mxu1 %v1729_v15 }
 0x25b   : > { %1641 = vmatmul.mubr.f32.gmra.mrb[2].mxu0 %v1054_v32 }
 0x25c   : > { %1732 = vmatpush3.bf16.msra.mxu1 %v1729_v15 }
 0x25d   : > { %1734 = vmatprep.subr.bf16.mxu1 %v1733_v3 }
 0x260   : > { %1736 = vmatpush3.bf16.msra.mxu1 %v1733_v3 }
 0x261   : > { %1738 = vmatprep.subr.bf16.mxu1 %v1737_v45 }
 0x264   : > { %1740 = vmatpush3.bf16.msra.mxu1 %v1737_v45 }
 0x265   : > { %1742 = vmatprep.subr.bf16.mxu1 %v1741_v16 }
 0x268   : > { %1744 = vmatpush3.bf16.msra.mxu1 %v1741_v16 }
 0x326   : > { %v1639_v17 = vpop.f32.mrb[0].mxu0 }
 0x327   : > { %v3106_v44 = vadd.f32 %v1639_v17, %v1555_v26  ;;  %v1144_v7 = vpop.f32.mrb[1].mxu0 }
 0x328   : > { %v3108_v58 = vadd.f32 %v1555_v26, %v1144_v7 }
 0x329   : > { %v1164_v52 = vand.u32 2147483647, %v3106_v44  ;;  %vm1240_vm7 = vcmp.ge.f32.partialorder %v3106_v44, 0.0 }
 0x32a   : > { %v1163_v18 = vand.u32 2147483647, %v3108_v58  ;;  %vm1239_vm8 = vcmp.ge.f32.partialorder %v3108_v58, 0.0 }
 0x32b   : > { %v1168_v23 = vmul.f32 0.70710677, %v1164_v52 }
 0x32c   : > { %v1167_v1 = vmul.f32 0.70710677, %v1163_v18 }
 0x32d   : > { %v1172_v9 = vmul.f32 0.3275911, %v1168_v23  ;;  %v1220_v28 = vmul.f32 %v1168_v23, %v1168_v23 }
 0x32e   : > { %v1642_v31 = vpop.f32.mrb[2].mxu0  ;;  %v1171_v36 = vmul.f32 0.3275911, %v1167_v1  ;;  %v1219_v37 = vmul.f32 %v1167_v1, %v1167_v1 }
 0x32f   : > { %v3112_v19 = vadd.f32 %v1642_v31, %v1555_v26  ;;  %v1154_v43 = vpop.f32.mrb[3].mxu0  ;;  %v1176_v24 = vadd.f32 1.0, %v1172_v9  ;;  %v1224_v6 = vsub.f32 0.0, %v1220_v28 }
 0x330   : > { %v3114_v20 = vadd.f32 %v1555_v26, %v1154_v43  ;;  %v1175_v21 = vadd.f32 1.0, %v1171_v36  ;;  %v1223_v13 = vsub.f32 0.0, %v1219_v37 }
 0x331   : > { %v1166_v35 = vand.u32 2147483647, %v3112_v19  ;;  %1855 = vrcp.f32 %v1176_v24  ;;  %v1229_v22 = vmul.f32 1.442695, %v1224_v6  ;;  %vm1242_vm9 = vcmp.ge.f32.partialorder %v3112_v19, 0.0 }
 0x332   : > { %v1165_v11 = vand.u32 2147483647, %v3114_v20  ;;  %1857 = vrcp.f32 %v1175_v21  ;;  %v1227_v32 = vmul.f32 1.442695, %v1223_v13  ;;  %vm1241_vm10 = vcmp.ge.f32.partialorder %v3114_v20, 0.0 }
 0x333   : > { %v1170_v29 = vmul.f32 0.70710677, %v1166_v35 }
 0x334   : > { %v1169_v25 = vmul.f32 0.70710677, %v1165_v11 }
 0x335   : > { %v1174_v0 = vmul.f32 0.3275911, %v1170_v29  ;;  %v1222_v56 = vmul.f32 %v1170_v29, %v1170_v29 }
 0x336   : > { %v1173_v39 = vmul.f32 0.3275911, %v1169_v25  ;;  %v1221_v12 = vmul.f32 %v1169_v25, %v1169_v25 }
 0x337   : > { %v1178_v46 = vadd.f32 1.0, %v1174_v0  ;;  %v1226_v48 = vsub.f32 0.0, %v1222_v56 }
 0x338   : > { %v1177_v27 = vadd.f32 1.0, %v1173_v39  ;;  %v1225_v51 = vsub.f32 0.0, %v1221_v12 }
 0x339   : > { %1859 = vrcp.f32 %v1178_v46  ;;  %v1233_v40 = vmul.f32 1.442695, %v1226_v48 }
 0x33a   : > { %1861 = vrcp.f32 %v1177_v27  ;;  %v1231_v55 = vmul.f32 1.442695, %v1225_v51 }
 0x33b   : > { %v1856_v60 = vpop.eup %1855  ;;  %1863 = vpow2.f32 %v1229_v22 }
 0x33c   : > { %v1858_v38 = vpop.eup %1857  ;;  %v1184_v49 = vmul.f32 0.5307027, %v1856_v60  ;;  %1865 = vpow2.f32 %v1227_v32  ;;  %v1364_v32 = vld [vmem:[%s2445_s7 + $0x8] sm:$0xff] }
 0x33d   : > { %v1183_v63 = vmul.f32 0.5307027, %v1858_v38  ;;  %1867 = vpow2.f32 %v1233_v40 }
 0x33e   : > { %v1188_v14 = vadd.f32 -0.72657603, %v1184_v49  ;;  %1869 = vpow2.f32 %v1231_v55 }
 0x33f   : > { %v1187_v50 = vadd.f32 -0.72657603, %v1183_v63 }
 0x340   : > { %v1192_v30 = vmul.f32 %v1856_v60, %v1188_v14 }
 0x341   : > { %v1191_v57 = vmul.f32 %v1858_v38, %v1187_v50 }
 0x342   : > { %v1196_v61 = vadd.f32 0.7107069, %v1192_v30 }
 0x343   : > { %v1860_v33 = vpop.eup %1859  ;;  %v1195_v41 = vadd.f32 0.7107069, %v1191_v57 }
 0x344   : > { %v1862_v53 = vpop.eup %1861  ;;  %v1186_v34 = vmul.f32 0.5307027, %v1860_v33  ;;  %v1200_v47 = vmul.f32 %v1856_v60, %v1196_v61 }
 0x345   : > { %v1185_v10 = vmul.f32 0.5307027, %v1862_v53  ;;  %v1199_v42 = vmul.f32 %v1858_v38, %v1195_v41  ;;  %v1864_v23 = vpop.eup %1863 }
 0x346   : > { %v1190_v62 = vadd.f32 -0.72657603, %v1186_v34  ;;  %v1204_v15 = vadd.f32 -0.14224836, %v1200_v47  ;;  %v1866_v31 = vpop.eup %1865  ;;  %v3374_v47 = vld [vmem:[#allocation26_spill] sm:$0xff] }
 0x347   : > { %v1189_v4 = vadd.f32 -0.72657603, %v1185_v10  ;;  %v1203_v3 = vadd.f32 -0.14224836, %v1199_v42  ;;  %v1868_v27 = vpop.eup %1867 }
 0x348   : > { %v1194_v54 = vmul.f32 %v1860_v33, %v1190_v62  ;;  %v1208_v59 = vmul.f32 %v1856_v60, %v1204_v15  ;;  %v1870_v6 = vpop.eup %1869 }
 0x349   : > { %v1193_v45 = vmul.f32 %v1862_v53, %v1189_v4  ;;  %v1207_v8 = vmul.f32 %v1858_v38, %v1203_v3 }
 0x34a   : > { %v1198_v2 = vadd.f32 0.7107069, %v1194_v54  ;;  %v1212_v16 = vadd.f32 0.1274148, %v1208_v59 }
 0x34b   : > { %v1197_v26 = vadd.f32 0.7107069, %v1193_v45  ;;  %v1211_v17 = vadd.f32 0.1274148, %v1207_v8 }
 0x34c   : > { %v1202_v7 = vmul.f32 %v1860_v33, %v1198_v2  ;;  %v1216_v52 = vmul.f32 %v1856_v60, %v1212_v16 }
 0x34d   : > { %v1201_v18 = vmul.f32 %v1862_v53, %v1197_v26  ;;  %v1215_v1 = vmul.f32 %v1858_v38, %v1211_v17 }
 0x34e   : > { %v1206_v9 = vadd.f32 -0.14224836, %v1202_v7  ;;  %v1236_v36 = vmul.f32 %v1864_v23, %v1216_v52 }
 0x34f   : > { %v1205_v43 = vadd.f32 -0.14224836, %v1201_v18  ;;  %v1235_v24 = vmul.f32 %v1866_v31, %v1215_v1 }
 0x350   : > { %v1210_v21 = vmul.f32 %v1860_v33, %v1206_v9  ;;  %v1244_v35 = vsub.f32 1.0, %v1236_v36 }
 0x351   : > { %v1209_v11 = vmul.f32 %v1862_v53, %v1205_v43  ;;  %v1243_v29 = vsub.f32 1.0, %v1235_v24 }
 0x352   : > { %v1214_v25 = vadd.f32 0.1274148, %v1210_v21  ;;  %v1248_v0 = vsel %vm1240_vm7, %v1244_v35, %v1236_v36 }
 0x353   : > { %v1213_v39 = vadd.f32 0.1274148, %v1209_v11  ;;  %v1247_v46 = vsel %vm1239_vm8, %v1243_v29, %v1235_v24  ;;  %v1252_v38 = vmul.f32 %v1248_v0, %v3106_v44  ;;  %v1556_v44 = vld [vmem:[%s3372_s22] ss:$0 sm:$0xff] }
 0x354   : > { %v1218_v28 = vmul.f32 %v1860_v33, %v1214_v25  ;;  %v1251_v37 = vmul.f32 %v1247_v46, %v3108_v58  ;;  %v1363_v33 = vld [vmem:[%s2445_s7] sm:$0xff] }
 0x355   : > { %v1217_v60 = vmul.f32 %v1862_v53, %v1213_v39 }
 0x356   : > { %v1238_v13 = vmul.f32 %v1868_v27, %v1218_v28  ;;  %1675 = vmatprep.mubr.f32.mxu1 %v1251_v37 }
 0x357   : > { %v1237_v49 = vmul.f32 %v1870_v6, %v1217_v60  ;;  %1676 = vmatmul.mubr.f32.vlgmr.msra.gmra.mrb[0].mxu1 %v1252_v38 }
 0x358   : > { %v1246_v63 = vsub.f32 1.0, %v1238_v13 }
 0x359   : > { %v1245_v56 = vsub.f32 1.0, %v1237_v49 }
 0x35a   : > { %v1250_v14 = vsel %vm1242_vm9, %v1246_v63, %v1238_v13 }
 0x35b   : > { %v1249_v22 = vsel %vm1241_vm10, %v1245_v56, %v1237_v49  ;;  %v1254_v12 = vmul.f32 %v1250_v14, %v3112_v19 }
 0x35c   : > { %v1253_v58 = vmul.f32 %v1249_v22, %v3114_v20 }
 0x35e   : > { %1678 = vmatprep.mubr.f32.mxu1 %v1253_v58 }
 0x35f   : > { %1679 = vmatmul.mubr.f32.gmra.mrb[2].mxu1 %v1254_v12 }
 0x42a   : > { %v1677_v50 = vpop.f32.mrb[0].mxu1 }
 0x42b   : > { %v1350_v30 = vadd.f32 %v1677_v50, %v1556_v44  ;;  %v1344_v57 = vpop.f32.mrb[1].mxu1 }
 0x42c   : > { %v1345_v48 = vadd.f32 %v1556_v44, %v1344_v57 }
 0x42d   : > { %v1368_v61 = vadd.f32 %v1364_v32, %v1350_v30 }
 0x42e   : > { %v1367_v53 = vadd.f32 %v1363_v33, %v1345_v48 }
 0x42f   : > { %1372 = vst [vmem:[%s482_s0 + $0x8] sm:$0xff] %v1368_v61 }
 0x430   : > { %1371 = vst [vmem:[%s482_s0] sm:$0xff] %v1367_v53 }
 0x432   : > { %v1680_v19 = vpop.f32.mrb[2].mxu1 }
 0x433   : > { %v1360_v20 = vadd.f32 %v1680_v19, %v1556_v44  ;;  %v1354_v51 = vpop.f32.mrb[3].mxu1 }
 0x434   : > { %v1355_v41 = vadd.f32 %v1556_v44, %v1354_v51 }
 0x435   : > { %v1370_v34 = vadd.f32 %v1360_v20, %v2672_v5 }
 0x436   : > { %v1369_v10 = vadd.f32 %v1355_v41, %v3374_v47 }
 0x437   : > { %1374 = vst [vmem:[%s482_s0 + $0x18] sm:$0xff] %v1370_v34 }
 0x438   : > { %1373 = vst [vmem:[%s482_s0 + $0x10] sm:$0xff] %v1369_v10 }
 0x439   : > { %2028 = shalt.err (!%p2025_p11)
}
 0x43a   : > { %s2029_s27 = scalar_lea.hbm %s3140_s11, 512  ;;  %s2033_s30 = scalar_lea.hbm %s3373_s19, 1024 }
 0x43b   : > { %p2030_p12 = scmp.ne.s32.totalorder %s3140_s11, %s2029_s27  ;;  %p2034_p9 = scmp.lt.u32.totalorder %s3140_s11, %s3373_s19 }
 0x43c   : > { %p2035_p0 = scmp.lt.u32.totalorder %s2033_s30, %s2029_s27  ;;  %p2037_p4 = scmp.lt.u32.totalorder %s2029_s27, %s3140_s11 }
 0x43d   : > { %p2031_p6 = pnand %p2030_p12, %p2332_p10 }
 0x43e   : > { %p2036_p2 = por %p2035_p0, %p2034_p9 }
 0x43f   : > { %p2032_p7 = pneg %p2031_p6 }
 0x440   : > { %p2038_p8 = por %p2037_p4, %p2036_p2 }
 0x442   : > { %p2039_p1 = pnand %p2038_p8, %p2032_p7 }
 0x444   : > { %2042 = shalt.err (!%p2039_p1)
}
 0x445   : > { %s2119_s22 = smov 128   ;;  %s2120_s0 = smov 8  }
 0x446   : > { %1761 = dma.vmem_to_hbm [thread:$0]  (%p2332_p10), %s3134_s6, 512, %s3140_s11, %s1376_s21, %s2119_s22, %s2119_s22, %s2120_s0  }
 0x447 PF: > { %s3375_s23 = sld [smem:[#allocation18_spill]]  ;;  %s3376_s7 = sld [smem:[#allocation20_spill]] }
 0x448   : > { %p3378_p3 = scmp.ge.s32.totalorder %s2109_s18, 2 }
 0x44d   : > { %s1406_s12 = sand.u32 1, %s3375_s23   ;;  %p3377_p13 = scmp.ne.s32.totalorder %s3376_s7, 0 }
 0x44e   : > { %s1407_s20 = scalar_lea.sflag [#allocation5], %s1406_s12 }
 0x44f   : > { %p1781_p5 = pnand %p3378_p3, %p3377_p13 }
 0x451   : > { %2084 = dma.done.wait (!%p1781_p5), %s1407_s20, 512  }
 0x452   : > { %2086 = vsyncadd (!%p1781_p5), %s1407_s20, 4294966784  ;;  %s30_s18 = sadd.s32 1, %s2109_s18   ;;  %s3379_s13 = smov %s2093_s14 }
 0x453   : > { %p27_p11 = scmp.ge.s32.totalorder %s30_s18, 4   ;;  %s3380_s14 = smov %s2097_s15 }
 0x454   : > { %s3381_s15 = smov %s2347_s24  ;;  %s3382_s16 = smov %s2105_s17 }
 0x455   : > { %s3383_s17 = smov %s3385_s26  ;;  %29 = sbr.rel (!%p27_p11) target bundleno = 17 (0x11), region = 130 }
 0x45c   :  { %1412 = vsyncpa [#allocation4], 1 }
 0x45d   :  { %1414 = vsyncpa [#allocation4 + $0x1], 1 }
 0x45e   :  { %1415 = vsyncpa [#allocation7], 1 }
 0x45f   :  { %1417 = vsyncpa [#allocation7 + $0x1], 1 }
 0x460   :  { %1418 = vsyncpa [#allocation10], 1 }
 0x461   :  { %1419 = vsyncpa [#allocation5], 1 }
 0x462   :  { %1421 = vsyncpa [#allocation5 + $0x1], 1 }

</bundles_post_ra>
